<compile_context>
chip_gen: v7x
topology: tpu7x:2x2x1
jax: 0.10.0
libtpu: 0.0.40
codegen_flags: <defaults>
</compile_context>

<pallas_src>
import functools
import math

import jax
import jax.numpy as jnp
from jax.experimental import pallas as pl
from jax.experimental.pallas import tpu as pltpu


# ---------------------------------------------------------------------------
# Fused kernel: all LSTM layers + Linear head in a single invocation
# ---------------------------------------------------------------------------
def _fused_lstm_kernel(*refs, num_layers, seq_len, batch, hidden_size):
    """Ref layout (inputs, then outputs, then scratch):

    inputs : x2d (T*B, D0), h0_all (L, B, H), c0_all (L, B, H),
             [w_ih_t (d_in, 4H), w_hh_t (H, 4H), b (1, 4H)] * L,
             w_lin_t (H, O), b_lin (1, O)
    outputs: out (B, O)
    scratch: gin_sc (T*B, 4H) f32   -- hoisted input projection of a layer
             act_sc (T*B, H)  f32   -- inter-layer hidden states (stay in VMEM)
    """
    n_in = 3 + 3 * num_layers + 2
    x2d_ref, h0_ref, c0_ref = refs[0], refs[1], refs[2]
    layer_refs = [refs[3 + 3 * l: 6 + 3 * l] for l in range(num_layers)]
    wlin_ref = refs[3 + 3 * num_layers]
    blin_ref = refs[4 + 3 * num_layers]
    out_ref = refs[n_in]
    gin_sc = refs[n_in + 1]
    act_sc = refs[n_in + 2]

    T, B, H = seq_len, batch, hidden_size

    h_last = None
    for layer in range(num_layers):
        wih_ref, whh_ref, b_ref = layer_refs[layer]

        # Layer input for the whole sequence, folded to (T*B, d_in).
        layer_in = x2d_ref[...] if layer == 0 else act_sc[...]

        # Hoisted, batched input projection + bias (one wide MXU call/layer).
        gin_sc[...] = (jnp.dot(layer_in, wih_ref[...],
                               preferred_element_type=jnp.float32)
                       + b_ref[...])

        whh = whh_ref[...]                 # (H, 4H), loaded once per layer
        h = h0_ref[layer]                  # (B, H)
        c = c0_ref[layer]                  # (B, H)
        write_out = layer < num_layers - 1  # only lower layers feed the next one

        # Sequential recurrence, statically unrolled (T is small & fixed).
        for t in range(T):
            g = gin_sc[pl.ds(t * B, B), :] + jnp.dot(
                h, whh, preferred_element_type=jnp.float32)   # (B, 4H)

            # Two full-lane activation passes instead of four quarter-lane ones.
            sig = jax.nn.sigmoid(g)
            tnh = jnp.tanh(g)
            i_g = sig[:, 0 * H:1 * H]
            f_g = sig[:, 1 * H:2 * H]
            g_g = tnh[:, 2 * H:3 * H]
            o_g = sig[:, 3 * H:4 * H]

            c = f_g * c + i_g * g_g
            h = o_g * jnp.tanh(c)

            if write_out:
                act_sc[pl.ds(t * B, B), :] = h

        h_last = h

    # Linear head on the top layer's last hidden state only.
    out_ref[...] = (jnp.dot(h_last, wlin_ref[...],
                            preferred_element_type=jnp.float32)
                    + blin_ref[...]).astype(out_ref.dtype)


# ---------------------------------------------------------------------------
# Wrapper
# ---------------------------------------------------------------------------
def lstm_forward(input_seq, params, h0_all, c0_all):
    """Full forward pass of the torch LSTM module, fused into one pallas_call.

    input_seq : (B, T, input_size)   [batch_first, like PyTorch]
    h0_all/c0_all : (num_layers, B, H)
    Returns   : (B, output_size)
    """
    B, T, D = input_seq.shape
    L, _, H = h0_all.shape
    O = params["w_lin_t"].shape[-1]

    # Time-major, then fold time into rows so the hoisted input projection is
    # one (T*B, D) x (D, 4H) matmul.
    x2d = jnp.transpose(input_seq, (1, 0, 2)).reshape(T * B, D).astype(jnp.float32)

    flat_layer_args = []
    for lp in params["lstm_layers"]:
        flat_layer_args += [lp["w_ih_t"], lp["w_hh_t"], lp["b"]]

    kernel = functools.partial(_fused_lstm_kernel, num_layers=L, seq_len=T,
                               batch=B, hidden_size=H)

    return pl.pallas_call(
        kernel,
        out_shape=jax.ShapeDtypeStruct((B, O), jnp.float32),
        scratch_shapes=[
            pltpu.VMEM((T * B, 4 * H), jnp.float32),   # hoisted gate projection
            pltpu.VMEM((T * B, H), jnp.float32),       # inter-layer activations
        ],
    )(x2d, h0_all.astype(jnp.float32), c0_all.astype(jnp.float32),
      *flat_layer_args, params["w_lin_t"], params["b_lin"])


# ---------------------------------------------------------------------------
# Deterministic parameter initialization (mimics nn.LSTM / nn.Linear shapes)
# ---------------------------------------------------------------------------
def init_params(key, input_size, hidden_size, num_layers, output_size):
    params = {"lstm_layers": []}
    bound = 1.0 / math.sqrt(hidden_size)
    for layer in range(num_layers):
        d_in = input_size if layer == 0 else hidden_size
        key, k1, k2, k3, k4 = jax.random.split(key, 5)
        w_ih = jax.random.uniform(k1, (4 * hidden_size, d_in),
                                  minval=-bound, maxval=bound, dtype=jnp.float32)
        w_hh = jax.random.uniform(k2, (4 * hidden_size, hidden_size),
                                  minval=-bound, maxval=bound, dtype=jnp.float32)
        b_ih = jax.random.uniform(k3, (4 * hidden_size,),
                                  minval=-bound, maxval=bound, dtype=jnp.float32)
        b_hh = jax.random.uniform(k4, (4 * hidden_size,),
                                  minval=-bound, maxval=bound, dtype=jnp.float32)
        params["lstm_layers"].append({
            "w_ih_t": w_ih.T,                       # (d_in, 4H)
            "w_hh_t": w_hh.T,                       # (H, 4H)
            "b": (b_ih + b_hh)[None, :],            # (1, 4H)
        })
    key, k5, k6 = jax.random.split(key, 3)
    lin_bound = 1.0 / math.sqrt(hidden_size)
    w_lin = jax.random.uniform(k5, (output_size, hidden_size),
                               minval=-lin_bound, maxval=lin_bound, dtype=jnp.float32)
    b_lin = jax.random.uniform(k6, (output_size,),
                               minval=-lin_bound, maxval=lin_bound, dtype=jnp.float32)
    params["w_lin_t"] = w_lin.T                     # (H, O)
    params["b_lin"] = b_lin[None, :]                # (1, O)
    return params


# ---------------------------------------------------------------------------
# Pure-JAX reference for correctness check
# ---------------------------------------------------------------------------
def lstm_forward_ref(input_seq, params, h0_all, c0_all):
    x = jnp.transpose(input_seq, (1, 0, 2)).astype(jnp.float32)  # (T, B, D)
    H = h0_all.shape[-1]
    for layer_idx, lp in enumerate(params["lstm_layers"]):
        h, c = h0_all[layer_idx], c0_all[layer_idx]
        outs = []
        for t in range(x.shape[0]):
            gates = x[t] @ lp["w_ih_t"] + h @ lp["w_hh_t"] + lp["b"]
            i_g = jax.nn.sigmoid(gates[:, 0 * H:1 * H])
            f_g = jax.nn.sigmoid(gates[:, 1 * H:2 * H])
            g_g = jnp.tanh(gates[:, 2 * H:3 * H])
            o_g = jax.nn.sigmoid(gates[:, 3 * H:4 * H])
            c = f_g * c + i_g * g_g
            h = o_g * jnp.tanh(c)
            outs.append(h)
        x = jnp.stack(outs, axis=0)
    return x[-1] @ params["w_lin_t"] + params["b_lin"]


# ---------------------------------------------------------------------------
if __name__ == "__main__":
    # Small shapes consistent with the module's forward
    batch = 2
    seq_len = 8
    input_size = 4
    hidden_size = 32
    num_layers = 2
    output_size = 5

    key = jax.random.PRNGKey(0)
    key, k_x, k_h0, k_c0, k_p = jax.random.split(key, 5)

    input_seq = jax.random.normal(k_x, (batch, seq_len, input_size), jnp.float32)
    # forward() draws h_0, c_0 from randn each call -> deterministic draws here
    h0_all = jax.random.normal(k_h0, (num_layers, batch, hidden_size), jnp.float32)
    c0_all = jax.random.normal(k_c0, (num_layers, batch, hidden_size), jnp.float32)

    params = init_params(k_p, input_size, hidden_size, num_layers, output_size)

    # TODO(synk): inter-layer dropout not implemented (module default dropout=0).
    pred = lstm_forward(input_seq, params, h0_all, c0_all)
    pred = jax.block_until_ready(pred)

    ref = lstm_forward_ref(input_seq, params, h0_all, c0_all)
    assert pred.shape == (batch, output_size), pred.shape
    assert jnp.allclose(pred, ref, atol=1e-4, rtol=1e-4), (pred, ref)

    print("KERNEL_OK")
</pallas_src>

<mosaic_0001>
module attributes {stable_mosaic.version = 11 : i64} {
  func.func @_fused_lstm_kernel(%arg0: memref<16x4xf32, #tpu.memory_space<vmem>>, %arg1: memref<2x2x32xf32, #tpu.memory_space<vmem>>, %arg2: memref<2x2x32xf32, #tpu.memory_space<vmem>>, %arg3: memref<4x128xf32, #tpu.memory_space<vmem>>, %arg4: memref<32x128xf32, #tpu.memory_space<vmem>>, %arg5: memref<1x128xf32, #tpu.memory_space<vmem>>, %arg6: memref<32x128xf32, #tpu.memory_space<vmem>>, %arg7: memref<32x128xf32, #tpu.memory_space<vmem>>, %arg8: memref<1x128xf32, #tpu.memory_space<vmem>>, %arg9: memref<32x5xf32, #tpu.memory_space<vmem>>, %arg10: memref<1x5xf32, #tpu.memory_space<vmem>>, %arg11: memref<2x5xf32, #tpu.memory_space<vmem>>, %arg12: memref<16x128xf32, #tpu.memory_space<vmem>>, %arg13: memref<16x32xf32, #tpu.memory_space<vmem>>) attributes {dimension_semantics = [], scalar_prefetch = 0 : i64, scratch_operands = 2 : i64, tpu.core_type = #tpu.core_type<tc>} {
    %c0 = arith.constant 0 : index
    %c0_0 = arith.constant 0 : index
    %0 = vector.load %arg0[%c0, %c0_0] : memref<16x4xf32, #tpu.memory_space<vmem>>, vector<16x4xf32>
    %c0_1 = arith.constant 0 : index
    %c0_2 = arith.constant 0 : index
    %1 = vector.load %arg3[%c0_1, %c0_2] : memref<4x128xf32, #tpu.memory_space<vmem>>, vector<4x128xf32>
    %cst = arith.constant dense<0.000000e+00> : vector<16x128xf32>
    %2 = tpu.matmul %0, %1, %cst {dimension_numbers = #tpu.dot_dimension_numbers<[1], [0], [0], [1], [0, 0, 1, 1], [], []>} : vector<16x4xf32>, vector<4x128xf32>, vector<16x128xf32> -> vector<16x128xf32>
    %c0_3 = arith.constant 0 : index
    %c0_4 = arith.constant 0 : index
    %3 = vector.load %arg5[%c0_3, %c0_4] : memref<1x128xf32, #tpu.memory_space<vmem>>, vector<1x128xf32>
    %4 = vector.broadcast %3 : vector<1x128xf32> to vector<16x128xf32>
    %5 = arith.addf %2, %4 : vector<16x128xf32>
    %c0_5 = arith.constant 0 : index
    %c0_6 = arith.constant 0 : index
    %6 = vector.load %arg12[%c0_5, %c0_6] : memref<16x128xf32, #tpu.memory_space<vmem>>, vector<16x128xf32>
    tpu.vector_store %arg12[%c0_5, %c0_6], %5 {strides = array<i32>} : memref<16x128xf32, #tpu.memory_space<vmem>>, vector<16x128xf32>,
    %c0_7 = arith.constant 0 : index
    %c0_8 = arith.constant 0 : index
    %7 = vector.load %arg4[%c0_7, %c0_8] : memref<32x128xf32, #tpu.memory_space<vmem>>, vector<32x128xf32>
    %c0_9 = arith.constant 0 : index
    %c0_10 = arith.constant 0 : index
    %c0_11 = arith.constant 0 : index
    %8 = vector.load %arg1[%c0_9, %c0_10, %c0_11] : memref<2x2x32xf32, #tpu.memory_space<vmem>>, vector<1x2x32xf32>
    %9 = vector.shape_cast %8 : vector<1x2x32xf32> to vector<2x32xf32>
    %c0_12 = arith.constant 0 : index
    %c0_13 = arith.constant 0 : index
    %c0_14 = arith.constant 0 : index
    %10 = vector.load %arg2[%c0_12, %c0_13, %c0_14] : memref<2x2x32xf32, #tpu.memory_space<vmem>>, vector<1x2x32xf32>
    %11 = vector.shape_cast %10 : vector<1x2x32xf32> to vector<2x32xf32>
    %c0_15 = arith.constant 0 : index
    %c0_16 = arith.constant 0 : index
    %12 = vector.load %arg12[%c0_15, %c0_16] : memref<16x128xf32, #tpu.memory_space<vmem>>, vector<2x128xf32>
    %cst_17 = arith.constant dense<0.000000e+00> : vector<2x128xf32>
    %13 = tpu.matmul %9, %7, %cst_17 {dimension_numbers = #tpu.dot_dimension_numbers<[1], [0], [0], [1], [0, 0, 1, 1], [], []>} : vector<2x32xf32>, vector<32x128xf32>, vector<2x128xf32> -> vector<2x128xf32>
    %14 = arith.addf %12, %13 : vector<2x128xf32>
    %15 = arith.negf %14 : vector<2x128xf32>
    %16 = math.exp %15 : vector<2x128xf32>
    %cst_18 = arith.constant 1.000000e+00 : f32
    %17 = vector.broadcast %cst_18 : f32 to vector<2x128xf32>
    %18 = arith.addf %17, %16 : vector<2x128xf32>
    %19 = arith.divf %17, %18 : vector<2x128xf32>
    %20 = math.tanh %14 : vector<2x128xf32>
    %21 = vector.extract_strided_slice %19 {offsets = [0, 0], sizes = [2, 32], strides = [1, 1]} : vector<2x128xf32> to vector<2x32xf32>
    %22 = vector.extract_strided_slice %19 {offsets = [0, 32], sizes = [2, 32], strides = [1, 1]} : vector<2x128xf32> to vector<2x32xf32>
    %23 = vector.extract_strided_slice %20 {offsets = [0, 64], sizes = [2, 32], strides = [1, 1]} : vector<2x128xf32> to vector<2x32xf32>
    %24 = vector.extract_strided_slice %19 {offsets = [0, 96], sizes = [2, 32], strides = [1, 1]} : vector<2x128xf32> to vector<2x32xf32>
    %25 = arith.mulf %22, %11 : vector<2x32xf32>
    %26 = arith.mulf %21, %23 : vector<2x32xf32>
    %27 = arith.addf %25, %26 : vector<2x32xf32>
    %28 = math.tanh %27 : vector<2x32xf32>
    %29 = arith.mulf %24, %28 : vector<2x32xf32>
    %c0_19 = arith.constant 0 : index
    %c0_20 = arith.constant 0 : index
    %30 = vector.load %arg13[%c0_19, %c0_20] : memref<16x32xf32, #tpu.memory_space<vmem>>, vector<2x32xf32>
    tpu.vector_store %arg13[%c0_19, %c0_20], %29 {strides = array<i32>} : memref<16x32xf32, #tpu.memory_space<vmem>>, vector<2x32xf32>,
    %c2 = arith.constant 2 : index
    %c0_21 = arith.constant 0 : index
    %31 = vector.load %arg12[%c2, %c0_21] : memref<16x128xf32, #tpu.memory_space<vmem>>, vector<2x128xf32>
    %cst_22 = arith.constant dense<0.000000e+00> : vector<2x128xf32>
    %32 = tpu.matmul %29, %7, %cst_22 {dimension_numbers = #tpu.dot_dimension_numbers<[1], [0], [0], [1], [0, 0, 1, 1], [], []>} : vector<2x32xf32>, vector<32x128xf32>, vector<2x128xf32> -> vector<2x128xf32>
    %33 = arith.addf %31, %32 : vector<2x128xf32>
    %34 = arith.negf %33 : vector<2x128xf32>
    %35 = math.exp %34 : vector<2x128xf32>
    %cst_23 = arith.constant 1.000000e+00 : f32
    %36 = vector.broadcast %cst_23 : f32 to vector<2x128xf32>
    %37 = arith.addf %36, %35 : vector<2x128xf32>
    %38 = arith.divf %36, %37 : vector<2x128xf32>
    %39 = math.tanh %33 : vector<2x128xf32>
    %40 = vector.extract_strided_slice %38 {offsets = [0, 0], sizes = [2, 32], strides = [1, 1]} : vector<2x128xf32> to vector<2x32xf32>
    %41 = vector.extract_strided_slice %38 {offsets = [0, 32], sizes = [2, 32], strides = [1, 1]} : vector<2x128xf32> to vector<2x32xf32>
    %42 = vector.extract_strided_slice %39 {offsets = [0, 64], sizes = [2, 32], strides = [1, 1]} : vector<2x128xf32> to vector<2x32xf32>
    %43 = vector.extract_strided_slice %38 {offsets = [0, 96], sizes = [2, 32], strides = [1, 1]} : vector<2x128xf32> to vector<2x32xf32>
    %44 = arith.mulf %41, %27 : vector<2x32xf32>
    %45 = arith.mulf %40, %42 : vector<2x32xf32>
    %46 = arith.addf %44, %45 : vector<2x32xf32>
    %47 = math.tanh %46 : vector<2x32xf32>
    %48 = arith.mulf %43, %47 : vector<2x32xf32>
    %c2_24 = arith.constant 2 : index
    %c0_25 = arith.constant 0 : index
    %49 = vector.load %arg13[%c2_24, %c0_25] : memref<16x32xf32, #tpu.memory_space<vmem>>, vector<2x32xf32>
    tpu.vector_store %arg13[%c2_24, %c0_25], %48 {strides = array<i32>} : memref<16x32xf32, #tpu.memory_space<vmem>>, vector<2x32xf32>,
    %c4 = arith.constant 4 : index
    %c0_26 = arith.constant 0 : index
    %50 = vector.load %arg12[%c4, %c0_26] : memref<16x128xf32, #tpu.memory_space<vmem>>, vector<2x128xf32>
    %cst_27 = arith.constant dense<0.000000e+00> : vector<2x128xf32>
    %51 = tpu.matmul %48, %7, %cst_27 {dimension_numbers = #tpu.dot_dimension_numbers<[1], [0], [0], [1], [0, 0, 1, 1], [], []>} : vector<2x32xf32>, vector<32x128xf32>, vector<2x128xf32> -> vector<2x128xf32>
    %52 = arith.addf %50, %51 : vector<2x128xf32>
    %53 = arith.negf %52 : vector<2x128xf32>
    %54 = math.exp %53 : vector<2x128xf32>
    %cst_28 = arith.constant 1.000000e+00 : f32
    %55 = vector.broadcast %cst_28 : f32 to vector<2x128xf32>
    %56 = arith.addf %55, %54 : vector<2x128xf32>
    %57 = arith.divf %55, %56 : vector<2x128xf32>
    %58 = math.tanh %52 : vector<2x128xf32>
    %59 = vector.extract_strided_slice %57 {offsets = [0, 0], sizes = [2, 32], strides = [1, 1]} : vector<2x128xf32> to vector<2x32xf32>
    %60 = vector.extract_strided_slice %57 {offsets = [0, 32], sizes = [2, 32], strides = [1, 1]} : vector<2x128xf32> to vector<2x32xf32>
    %61 = vector.extract_strided_slice %58 {offsets = [0, 64], sizes = [2, 32], strides = [1, 1]} : vector<2x128xf32> to vector<2x32xf32>
    %62 = vector.extract_strided_slice %57 {offsets = [0, 96], sizes = [2, 32], strides = [1, 1]} : vector<2x128xf32> to vector<2x32xf32>
    %63 = arith.mulf %60, %46 : vector<2x32xf32>
    %64 = arith.mulf %59, %61 : vector<2x32xf32>
    %65 = arith.addf %63, %64 : vector<2x32xf32>
    %66 = math.tanh %65 : vector<2x32xf32>
    %67 = arith.mulf %62, %66 : vector<2x32xf32>
    %c4_29 = arith.constant 4 : index
    %c0_30 = arith.constant 0 : index
    %68 = vector.load %arg13[%c4_29, %c0_30] : memref<16x32xf32, #tpu.memory_space<vmem>>, vector<2x32xf32>
    tpu.vector_store %arg13[%c4_29, %c0_30], %67 {strides = array<i32>} : memref<16x32xf32, #tpu.memory_space<vmem>>, vector<2x32xf32>,
    %c6 = arith.constant 6 : index
    %c0_31 = arith.constant 0 : index
    %69 = vector.load %arg12[%c6, %c0_31] : memref<16x128xf32, #tpu.memory_space<vmem>>, vector<2x128xf32>
    %cst_32 = arith.constant dense<0.000000e+00> : vector<2x128xf32>
    %70 = tpu.matmul %67, %7, %cst_32 {dimension_numbers = #tpu.dot_dimension_numbers<[1], [0], [0], [1], [0, 0, 1, 1], [], []>} : vector<2x32xf32>, vector<32x128xf32>, vector<2x128xf32> -> vector<2x128xf32>
    %71 = arith.addf %69, %70 : vector<2x128xf32>
    %72 = arith.negf %71 : vector<2x128xf32>
    %73 = math.exp %72 : vector<2x128xf32>
    %cst_33 = arith.constant 1.000000e+00 : f32
    %74 = vector.broadcast %cst_33 : f32 to vector<2x128xf32>
    %75 = arith.addf %74, %73 : vector<2x128xf32>
    %76 = arith.divf %74, %75 : vector<2x128xf32>
    %77 = math.tanh %71 : vector<2x128xf32>
    %78 = vector.extract_strided_slice %76 {offsets = [0, 0], sizes = [2, 32], strides = [1, 1]} : vector<2x128xf32> to vector<2x32xf32>
    %79 = vector.extract_strided_slice %76 {offsets = [0, 32], sizes = [2, 32], strides = [1, 1]} : vector<2x128xf32> to vector<2x32xf32>
    %80 = vector.extract_strided_slice %77 {offsets = [0, 64], sizes = [2, 32], strides = [1, 1]} : vector<2x128xf32> to vector<2x32xf32>
    %81 = vector.extract_strided_slice %76 {offsets = [0, 96], sizes = [2, 32], strides = [1, 1]} : vector<2x128xf32> to vector<2x32xf32>
    %82 = arith.mulf %79, %65 : vector<2x32xf32>
    %83 = arith.mulf %78, %80 : vector<2x32xf32>
    %84 = arith.addf %82, %83 : vector<2x32xf32>
    %85 = math.tanh %84 : vector<2x32xf32>
    %86 = arith.mulf %81, %85 : vector<2x32xf32>
    %c6_34 = arith.constant 6 : index
    %c0_35 = arith.constant 0 : index
    %87 = vector.load %arg13[%c6_34, %c0_35] : memref<16x32xf32, #tpu.memory_space<vmem>>, vector<2x32xf32>
    tpu.vector_store %arg13[%c6_34, %c0_35], %86 {strides = array<i32>} : memref<16x32xf32, #tpu.memory_space<vmem>>, vector<2x32xf32>,
    %c8 = arith.constant 8 : index
    %c0_36 = arith.constant 0 : index
    %88 = vector.load %arg12[%c8, %c0_36] : memref<16x128xf32, #tpu.memory_space<vmem>>, vector<2x128xf32>
    %cst_37 = arith.constant dense<0.000000e+00> : vector<2x128xf32>
    %89 = tpu.matmul %86, %7, %cst_37 {dimension_numbers = #tpu.dot_dimension_numbers<[1], [0], [0], [1], [0, 0, 1, 1], [], []>} : vector<2x32xf32>, vector<32x128xf32>, vector<2x128xf32> -> vector<2x128xf32>
    %90 = arith.addf %88, %89 : vector<2x128xf32>
    %91 = arith.negf %90 : vector<2x128xf32>
    %92 = math.exp %91 : vector<2x128xf32>
    %cst_38 = arith.constant 1.000000e+00 : f32
    %93 = vector.broadcast %cst_38 : f32 to vector<2x128xf32>
    %94 = arith.addf %93, %92 : vector<2x128xf32>
    %95 = arith.divf %93, %94 : vector<2x128xf32>
    %96 = math.tanh %90 : vector<2x128xf32>
    %97 = vector.extract_strided_slice %95 {offsets = [0, 0], sizes = [2, 32], strides = [1, 1]} : vector<2x128xf32> to vector<2x32xf32>
    %98 = vector.extract_strided_slice %95 {offsets = [0, 32], sizes = [2, 32], strides = [1, 1]} : vector<2x128xf32> to vector<2x32xf32>
    %99 = vector.extract_strided_slice %96 {offsets = [0, 64], sizes = [2, 32], strides = [1, 1]} : vector<2x128xf32> to vector<2x32xf32>
    %100 = vector.extract_strided_slice %95 {offsets = [0, 96], sizes = [2, 32], strides = [1, 1]} : vector<2x128xf32> to vector<2x32xf32>
    %101 = arith.mulf %98, %84 : vector<2x32xf32>
    %102 = arith.mulf %97, %99 : vector<2x32xf32>
    %103 = arith.addf %101, %102 : vector<2x32xf32>
    %104 = math.tanh %103 : vector<2x32xf32>
    %105 = arith.mulf %100, %104 : vector<2x32xf32>
    %c8_39 = arith.constant 8 : index
    %c0_40 = arith.constant 0 : index
    %106 = vector.load %arg13[%c8_39, %c0_40] : memref<16x32xf32, #tpu.memory_space<vmem>>, vector<2x32xf32>
    tpu.vector_store %arg13[%c8_39, %c0_40], %105 {strides = array<i32>} : memref<16x32xf32, #tpu.memory_space<vmem>>, vector<2x32xf32>,
    %c10 = arith.constant 10 : index
    %c0_41 = arith.constant 0 : index
    %107 = vector.load %arg12[%c10, %c0_41] : memref<16x128xf32, #tpu.memory_space<vmem>>, vector<2x128xf32>
    %cst_42 = arith.constant dense<0.000000e+00> : vector<2x128xf32>
    %108 = tpu.matmul %105, %7, %cst_42 {dimension_numbers = #tpu.dot_dimension_numbers<[1], [0], [0], [1], [0, 0, 1, 1], [], []>} : vector<2x32xf32>, vector<32x128xf32>, vector<2x128xf32> -> vector<2x128xf32>
    %109 = arith.addf %107, %108 : vector<2x128xf32>
    %110 = arith.negf %109 : vector<2x128xf32>
    %111 = math.exp %110 : vector<2x128xf32>
    %cst_43 = arith.constant 1.000000e+00 : f32
    %112 = vector.broadcast %cst_43 : f32 to vector<2x128xf32>
    %113 = arith.addf %112, %111 : vector<2x128xf32>
    %114 = arith.divf %112, %113 : vector<2x128xf32>
    %115 = math.tanh %109 : vector<2x128xf32>
    %116 = vector.extract_strided_slice %114 {offsets = [0, 0], sizes = [2, 32], strides = [1, 1]} : vector<2x128xf32> to vector<2x32xf32>
    %117 = vector.extract_strided_slice %114 {offsets = [0, 32], sizes = [2, 32], strides = [1, 1]} : vector<2x128xf32> to vector<2x32xf32>
    %118 = vector.extract_strided_slice %115 {offsets = [0, 64], sizes = [2, 32], strides = [1, 1]} : vector<2x128xf32> to vector<2x32xf32>
    %119 = vector.extract_strided_slice %114 {offsets = [0, 96], sizes = [2, 32], strides = [1, 1]} : vector<2x128xf32> to vector<2x32xf32>
    %120 = arith.mulf %117, %103 : vector<2x32xf32>
    %121 = arith.mulf %116, %118 : vector<2x32xf32>
    %122 = arith.addf %120, %121 : vector<2x32xf32>
    %123 = math.tanh %122 : vector<2x32xf32>
    %124 = arith.mulf %119, %123 : vector<2x32xf32>
    %c10_44 = arith.constant 10 : index
    %c0_45 = arith.constant 0 : index
    %125 = vector.load %arg13[%c10_44, %c0_45] : memref<16x32xf32, #tpu.memory_space<vmem>>, vector<2x32xf32>
    tpu.vector_store %arg13[%c10_44, %c0_45], %124 {strides = array<i32>} : memref<16x32xf32, #tpu.memory_space<vmem>>, vector<2x32xf32>,
    %c12 = arith.constant 12 : index
    %c0_46 = arith.constant 0 : index
    %126 = vector.load %arg12[%c12, %c0_46] : memref<16x128xf32, #tpu.memory_space<vmem>>, vector<2x128xf32>
    %cst_47 = arith.constant dense<0.000000e+00> : vector<2x128xf32>
    %127 = tpu.matmul %124, %7, %cst_47 {dimension_numbers = #tpu.dot_dimension_numbers<[1], [0], [0], [1], [0, 0, 1, 1], [], []>} : vector<2x32xf32>, vector<32x128xf32>, vector<2x128xf32> -> vector<2x128xf32>
    %128 = arith.addf %126, %127 : vector<2x128xf32>
    %129 = arith.negf %128 : vector<2x128xf32>
    %130 = math.exp %129 : vector<2x128xf32>
    %cst_48 = arith.constant 1.000000e+00 : f32
    %131 = vector.broadcast %cst_48 : f32 to vector<2x128xf32>
    %132 = arith.addf %131, %130 : vector<2x128xf32>
    %133 = arith.divf %131, %132 : vector<2x128xf32>
    %134 = math.tanh %128 : vector<2x128xf32>
    %135 = vector.extract_strided_slice %133 {offsets = [0, 0], sizes = [2, 32], strides = [1, 1]} : vector<2x128xf32> to vector<2x32xf32>
    %136 = vector.extract_strided_slice %133 {offsets = [0, 32], sizes = [2, 32], strides = [1, 1]} : vector<2x128xf32> to vector<2x32xf32>
    %137 = vector.extract_strided_slice %134 {offsets = [0, 64], sizes = [2, 32], strides = [1, 1]} : vector<2x128xf32> to vector<2x32xf32>
    %138 = vector.extract_strided_slice %133 {offsets = [0, 96], sizes = [2, 32], strides = [1, 1]} : vector<2x128xf32> to vector<2x32xf32>
    %139 = arith.mulf %136, %122 : vector<2x32xf32>
    %140 = arith.mulf %135, %137 : vector<2x32xf32>
    %141 = arith.addf %139, %140 : vector<2x32xf32>
    %142 = math.tanh %141 : vector<2x32xf32>
    %143 = arith.mulf %138, %142 : vector<2x32xf32>
    %c12_49 = arith.constant 12 : index
    %c0_50 = arith.constant 0 : index
    %144 = vector.load %arg13[%c12_49, %c0_50] : memref<16x32xf32, #tpu.memory_space<vmem>>, vector<2x32xf32>
    tpu.vector_store %arg13[%c12_49, %c0_50], %143 {strides = array<i32>} : memref<16x32xf32, #tpu.memory_space<vmem>>, vector<2x32xf32>,
    %c14 = arith.constant 14 : index
    %c0_51 = arith.constant 0 : index
    %145 = vector.load %arg12[%c14, %c0_51] : memref<16x128xf32, #tpu.memory_space<vmem>>, vector<2x128xf32>
    %cst_52 = arith.constant dense<0.000000e+00> : vector<2x128xf32>
    %146 = tpu.matmul %143, %7, %cst_52 {dimension_numbers = #tpu.dot_dimension_numbers<[1], [0], [0], [1], [0, 0, 1, 1], [], []>} : vector<2x32xf32>, vector<32x128xf32>, vector<2x128xf32> -> vector<2x128xf32>
    %147 = arith.addf %145, %146 : vector<2x128xf32>
    %148 = arith.negf %147 : vector<2x128xf32>
    %149 = math.exp %148 : vector<2x128xf32>
    %cst_53 = arith.constant 1.000000e+00 : f32
    %150 = vector.broadcast %cst_53 : f32 to vector<2x128xf32>
    %151 = arith.addf %150, %149 : vector<2x128xf32>
    %152 = arith.divf %150, %151 : vector<2x128xf32>
    %153 = math.tanh %147 : vector<2x128xf32>
    %154 = vector.extract_strided_slice %152 {offsets = [0, 0], sizes = [2, 32], strides = [1, 1]} : vector<2x128xf32> to vector<2x32xf32>
    %155 = vector.extract_strided_slice %152 {offsets = [0, 32], sizes = [2, 32], strides = [1, 1]} : vector<2x128xf32> to vector<2x32xf32>
    %156 = vector.extract_strided_slice %153 {offsets = [0, 64], sizes = [2, 32], strides = [1, 1]} : vector<2x128xf32> to vector<2x32xf32>
    %157 = vector.extract_strided_slice %152 {offsets = [0, 96], sizes = [2, 32], strides = [1, 1]} : vector<2x128xf32> to vector<2x32xf32>
    %158 = arith.mulf %155, %141 : vector<2x32xf32>
    %159 = arith.mulf %154, %156 : vector<2x32xf32>
    %160 = arith.addf %158, %159 : vector<2x32xf32>
    %161 = math.tanh %160 : vector<2x32xf32>
    %162 = arith.mulf %157, %161 : vector<2x32xf32>
    %c14_54 = arith.constant 14 : index
    %c0_55 = arith.constant 0 : index
    %163 = vector.load %arg13[%c14_54, %c0_55] : memref<16x32xf32, #tpu.memory_space<vmem>>, vector<2x32xf32>
    tpu.vector_store %arg13[%c14_54, %c0_55], %162 {strides = array<i32>} : memref<16x32xf32, #tpu.memory_space<vmem>>, vector<2x32xf32>,
    %c0_56 = arith.constant 0 : index
    %c0_57 = arith.constant 0 : index
    %164 = vector.load %arg13[%c0_56, %c0_57] : memref<16x32xf32, #tpu.memory_space<vmem>>, vector<16x32xf32>
    %c0_58 = arith.constant 0 : index
    %c0_59 = arith.constant 0 : index
    %165 = vector.load %arg6[%c0_58, %c0_59] : memref<32x128xf32, #tpu.memory_space<vmem>>, vector<32x128xf32>
    %cst_60 = arith.constant dense<0.000000e+00> : vector<16x128xf32>
    %166 = tpu.matmul %164, %165, %cst_60 {dimension_numbers = #tpu.dot_dimension_numbers<[1], [0], [0], [1], [0, 0, 1, 1], [], []>} : vector<16x32xf32>, vector<32x128xf32>, vector<16x128xf32> -> vector<16x128xf32>
    %c0_61 = arith.constant 0 : index
    %c0_62 = arith.constant 0 : index
    %167 = vector.load %arg8[%c0_61, %c0_62] : memref<1x128xf32, #tpu.memory_space<vmem>>, vector<1x128xf32>
    %168 = vector.broadcast %167 : vector<1x128xf32> to vector<16x128xf32>
    %169 = arith.addf %166, %168 : vector<16x128xf32>
    %c0_63 = arith.constant 0 : index
    %c0_64 = arith.constant 0 : index
    %170 = vector.load %arg12[%c0_63, %c0_64] : memref<16x128xf32, #tpu.memory_space<vmem>>, vector<16x128xf32>
    tpu.vector_store %arg12[%c0_63, %c0_64], %169 {strides = array<i32>} : memref<16x128xf32, #tpu.memory_space<vmem>>, vector<16x128xf32>,
    %c0_65 = arith.constant 0 : index
    %c0_66 = arith.constant 0 : index
    %171 = vector.load %arg7[%c0_65, %c0_66] : memref<32x128xf32, #tpu.memory_space<vmem>>, vector<32x128xf32>
    %c1 = arith.constant 1 : index
    %c0_67 = arith.constant 0 : index
    %c0_68 = arith.constant 0 : index
    %172 = vector.load %arg1[%c1, %c0_67, %c0_68] : memref<2x2x32xf32, #tpu.memory_space<vmem>>, vector<1x2x32xf32>
    %173 = vector.shape_cast %172 : vector<1x2x32xf32> to vector<2x32xf32>
    %c1_69 = arith.constant 1 : index
    %c0_70 = arith.constant 0 : index
    %c0_71 = arith.constant 0 : index
    %174 = vector.load %arg2[%c1_69, %c0_70, %c0_71] : memref<2x2x32xf32, #tpu.memory_space<vmem>>, vector<1x2x32xf32>
    %175 = vector.shape_cast %174 : vector<1x2x32xf32> to vector<2x32xf32>
    %c0_72 = arith.constant 0 : index
    %c0_73 = arith.constant 0 : index
    %176 = vector.load %arg12[%c0_72, %c0_73] : memref<16x128xf32, #tpu.memory_space<vmem>>, vector<2x128xf32>
    %cst_74 = arith.constant dense<0.000000e+00> : vector<2x128xf32>
    %177 = tpu.matmul %173, %171, %cst_74 {dimension_numbers = #tpu.dot_dimension_numbers<[1], [0], [0], [1], [0, 0, 1, 1], [], []>} : vector<2x32xf32>, vector<32x128xf32>, vector<2x128xf32> -> vector<2x128xf32>
    %178 = arith.addf %176, %177 : vector<2x128xf32>
    %179 = arith.negf %178 : vector<2x128xf32>
    %180 = math.exp %179 : vector<2x128xf32>
    %cst_75 = arith.constant 1.000000e+00 : f32
    %181 = vector.broadcast %cst_75 : f32 to vector<2x128xf32>
    %182 = arith.addf %181, %180 : vector<2x128xf32>
    %183 = arith.divf %181, %182 : vector<2x128xf32>
    %184 = math.tanh %178 : vector<2x128xf32>
    %185 = vector.extract_strided_slice %183 {offsets = [0, 0], sizes = [2, 32], strides = [1, 1]} : vector<2x128xf32> to vector<2x32xf32>
    %186 = vector.extract_strided_slice %183 {offsets = [0, 32], sizes = [2, 32], strides = [1, 1]} : vector<2x128xf32> to vector<2x32xf32>
    %187 = vector.extract_strided_slice %184 {offsets = [0, 64], sizes = [2, 32], strides = [1, 1]} : vector<2x128xf32> to vector<2x32xf32>
    %188 = vector.extract_strided_slice %183 {offsets = [0, 96], sizes = [2, 32], strides = [1, 1]} : vector<2x128xf32> to vector<2x32xf32>
    %189 = arith.mulf %186, %175 : vector<2x32xf32>
    %190 = arith.mulf %185, %187 : vector<2x32xf32>
    %191 = arith.addf %189, %190 : vector<2x32xf32>
    %192 = math.tanh %191 : vector<2x32xf32>
    %193 = arith.mulf %188, %192 : vector<2x32xf32>
    %c2_76 = arith.constant 2 : index
    %c0_77 = arith.constant 0 : index
    %194 = vector.load %arg12[%c2_76, %c0_77] : memref<16x128xf32, #tpu.memory_space<vmem>>, vector<2x128xf32>
    %cst_78 = arith.constant dense<0.000000e+00> : vector<2x128xf32>
    %195 = tpu.matmul %193, %171, %cst_78 {dimension_numbers = #tpu.dot_dimension_numbers<[1], [0], [0], [1], [0, 0, 1, 1], [], []>} : vector<2x32xf32>, vector<32x128xf32>, vector<2x128xf32> -> vector<2x128xf32>
    %196 = arith.addf %194, %195 : vector<2x128xf32>
    %197 = arith.negf %196 : vector<2x128xf32>
    %198 = math.exp %197 : vector<2x128xf32>
    %cst_79 = arith.constant 1.000000e+00 : f32
    %199 = vector.broadcast %cst_79 : f32 to vector<2x128xf32>
    %200 = arith.addf %199, %198 : vector<2x128xf32>
    %201 = arith.divf %199, %200 : vector<2x128xf32>
    %202 = math.tanh %196 : vector<2x128xf32>
    %203 = vector.extract_strided_slice %201 {offsets = [0, 0], sizes = [2, 32], strides = [1, 1]} : vector<2x128xf32> to vector<2x32xf32>
    %204 = vector.extract_strided_slice %201 {offsets = [0, 32], sizes = [2, 32], strides = [1, 1]} : vector<2x128xf32> to vector<2x32xf32>
    %205 = vector.extract_strided_slice %202 {offsets = [0, 64], sizes = [2, 32], strides = [1, 1]} : vector<2x128xf32> to vector<2x32xf32>
    %206 = vector.extract_strided_slice %201 {offsets = [0, 96], sizes = [2, 32], strides = [1, 1]} : vector<2x128xf32> to vector<2x32xf32>
    %207 = arith.mulf %204, %191 : vector<2x32xf32>
    %208 = arith.mulf %203, %205 : vector<2x32xf32>
    %209 = arith.addf %207, %208 : vector<2x32xf32>
    %210 = math.tanh %209 : vector<2x32xf32>
    %211 = arith.mulf %206, %210 : vector<2x32xf32>
    %c4_80 = arith.constant 4 : index
    %c0_81 = arith.constant 0 : index
    %212 = vector.load %arg12[%c4_80, %c0_81] : memref<16x128xf32, #tpu.memory_space<vmem>>, vector<2x128xf32>
    %cst_82 = arith.constant dense<0.000000e+00> : vector<2x128xf32>
    %213 = tpu.matmul %211, %171, %cst_82 {dimension_numbers = #tpu.dot_dimension_numbers<[1], [0], [0], [1], [0, 0, 1, 1], [], []>} : vector<2x32xf32>, vector<32x128xf32>, vector<2x128xf32> -> vector<2x128xf32>
    %214 = arith.addf %212, %213 : vector<2x128xf32>
    %215 = arith.negf %214 : vector<2x128xf32>
    %216 = math.exp %215 : vector<2x128xf32>
    %cst_83 = arith.constant 1.000000e+00 : f32
    %217 = vector.broadcast %cst_83 : f32 to vector<2x128xf32>
    %218 = arith.addf %217, %216 : vector<2x128xf32>
    %219 = arith.divf %217, %218 : vector<2x128xf32>
    %220 = math.tanh %214 : vector<2x128xf32>
    %221 = vector.extract_strided_slice %219 {offsets = [0, 0], sizes = [2, 32], strides = [1, 1]} : vector<2x128xf32> to vector<2x32xf32>
    %222 = vector.extract_strided_slice %219 {offsets = [0, 32], sizes = [2, 32], strides = [1, 1]} : vector<2x128xf32> to vector<2x32xf32>
    %223 = vector.extract_strided_slice %220 {offsets = [0, 64], sizes = [2, 32], strides = [1, 1]} : vector<2x128xf32> to vector<2x32xf32>
    %224 = vector.extract_strided_slice %219 {offsets = [0, 96], sizes = [2, 32], strides = [1, 1]} : vector<2x128xf32> to vector<2x32xf32>
    %225 = arith.mulf %222, %209 : vector<2x32xf32>
    %226 = arith.mulf %221, %223 : vector<2x32xf32>
    %227 = arith.addf %225, %226 : vector<2x32xf32>
    %228 = math.tanh %227 : vector<2x32xf32>
    %229 = arith.mulf %224, %228 : vector<2x32xf32>
    %c6_84 = arith.constant 6 : index
    %c0_85 = arith.constant 0 : index
    %230 = vector.load %arg12[%c6_84, %c0_85] : memref<16x128xf32, #tpu.memory_space<vmem>>, vector<2x128xf32>
    %cst_86 = arith.constant dense<0.000000e+00> : vector<2x128xf32>
    %231 = tpu.matmul %229, %171, %cst_86 {dimension_numbers = #tpu.dot_dimension_numbers<[1], [0], [0], [1], [0, 0, 1, 1], [], []>} : vector<2x32xf32>, vector<32x128xf32>, vector<2x128xf32> -> vector<2x128xf32>
    %232 = arith.addf %230, %231 : vector<2x128xf32>
    %233 = arith.negf %232 : vector<2x128xf32>
    %234 = math.exp %233 : vector<2x128xf32>
    %cst_87 = arith.constant 1.000000e+00 : f32
    %235 = vector.broadcast %cst_87 : f32 to vector<2x128xf32>
    %236 = arith.addf %235, %234 : vector<2x128xf32>
    %237 = arith.divf %235, %236 : vector<2x128xf32>
    %238 = math.tanh %232 : vector<2x128xf32>
    %239 = vector.extract_strided_slice %237 {offsets = [0, 0], sizes = [2, 32], strides = [1, 1]} : vector<2x128xf32> to vector<2x32xf32>
    %240 = vector.extract_strided_slice %237 {offsets = [0, 32], sizes = [2, 32], strides = [1, 1]} : vector<2x128xf32> to vector<2x32xf32>
    %241 = vector.extract_strided_slice %238 {offsets = [0, 64], sizes = [2, 32], strides = [1, 1]} : vector<2x128xf32> to vector<2x32xf32>
    %242 = vector.extract_strided_slice %237 {offsets = [0, 96], sizes = [2, 32], strides = [1, 1]} : vector<2x128xf32> to vector<2x32xf32>
    %243 = arith.mulf %240, %227 : vector<2x32xf32>
    %244 = arith.mulf %239, %241 : vector<2x32xf32>
    %245 = arith.addf %243, %244 : vector<2x32xf32>
    %246 = math.tanh %245 : vector<2x32xf32>
    %247 = arith.mulf %242, %246 : vector<2x32xf32>
    %c8_88 = arith.constant 8 : index
    %c0_89 = arith.constant 0 : index
    %248 = vector.load %arg12[%c8_88, %c0_89] : memref<16x128xf32, #tpu.memory_space<vmem>>, vector<2x128xf32>
    %cst_90 = arith.constant dense<0.000000e+00> : vector<2x128xf32>
    %249 = tpu.matmul %247, %171, %cst_90 {dimension_numbers = #tpu.dot_dimension_numbers<[1], [0], [0], [1], [0, 0, 1, 1], [], []>} : vector<2x32xf32>, vector<32x128xf32>, vector<2x128xf32> -> vector<2x128xf32>
    %250 = arith.addf %248, %249 : vector<2x128xf32>
    %251 = arith.negf %250 : vector<2x128xf32>
    %252 = math.exp %251 : vector<2x128xf32>
    %cst_91 = arith.constant 1.000000e+00 : f32
    %253 = vector.broadcast %cst_91 : f32 to vector<2x128xf32>
    %254 = arith.addf %253, %252 : vector<2x128xf32>
    %255 = arith.divf %253, %254 : vector<2x128xf32>
    %256 = math.tanh %250 : vector<2x128xf32>
    %257 = vector.extract_strided_slice %255 {offsets = [0, 0], sizes = [2, 32], strides = [1, 1]} : vector<2x128xf32> to vector<2x32xf32>
    %258 = vector.extract_strided_slice %255 {offsets = [0, 32], sizes = [2, 32], strides = [1, 1]} : vector<2x128xf32> to vector<2x32xf32>
    %259 = vector.extract_strided_slice %256 {offsets = [0, 64], sizes = [2, 32], strides = [1, 1]} : vector<2x128xf32> to vector<2x32xf32>
    %260 = vector.extract_strided_slice %255 {offsets = [0, 96], sizes = [2, 32], strides = [1, 1]} : vector<2x128xf32> to vector<2x32xf32>
    %261 = arith.mulf %258, %245 : vector<2x32xf32>
    %262 = arith.mulf %257, %259 : vector<2x32xf32>
    %263 = arith.addf %261, %262 : vector<2x32xf32>
    %264 = math.tanh %263 : vector<2x32xf32>
    %265 = arith.mulf %260, %264 : vector<2x32xf32>
    %c10_92 = arith.constant 10 : index
    %c0_93 = arith.constant 0 : index
    %266 = vector.load %arg12[%c10_92, %c0_93] : memref<16x128xf32, #tpu.memory_space<vmem>>, vector<2x128xf32>
    %cst_94 = arith.constant dense<0.000000e+00> : vector<2x128xf32>
    %267 = tpu.matmul %265, %171, %cst_94 {dimension_numbers = #tpu.dot_dimension_numbers<[1], [0], [0], [1], [0, 0, 1, 1], [], []>} : vector<2x32xf32>, vector<32x128xf32>, vector<2x128xf32> -> vector<2x128xf32>
    %268 = arith.addf %266, %267 : vector<2x128xf32>
    %269 = arith.negf %268 : vector<2x128xf32>
    %270 = math.exp %269 : vector<2x128xf32>
    %cst_95 = arith.constant 1.000000e+00 : f32
    %271 = vector.broadcast %cst_95 : f32 to vector<2x128xf32>
    %272 = arith.addf %271, %270 : vector<2x128xf32>
    %273 = arith.divf %271, %272 : vector<2x128xf32>
    %274 = math.tanh %268 : vector<2x128xf32>
    %275 = vector.extract_strided_slice %273 {offsets = [0, 0], sizes = [2, 32], strides = [1, 1]} : vector<2x128xf32> to vector<2x32xf32>
    %276 = vector.extract_strided_slice %273 {offsets = [0, 32], sizes = [2, 32], strides = [1, 1]} : vector<2x128xf32> to vector<2x32xf32>
    %277 = vector.extract_strided_slice %274 {offsets = [0, 64], sizes = [2, 32], strides = [1, 1]} : vector<2x128xf32> to vector<2x32xf32>
    %278 = vector.extract_strided_slice %273 {offsets = [0, 96], sizes = [2, 32], strides = [1, 1]} : vector<2x128xf32> to vector<2x32xf32>
    %279 = arith.mulf %276, %263 : vector<2x32xf32>
    %280 = arith.mulf %275, %277 : vector<2x32xf32>
    %281 = arith.addf %279, %280 : vector<2x32xf32>
    %282 = math.tanh %281 : vector<2x32xf32>
    %283 = arith.mulf %278, %282 : vector<2x32xf32>
    %c12_96 = arith.constant 12 : index
    %c0_97 = arith.constant 0 : index
    %284 = vector.load %arg12[%c12_96, %c0_97] : memref<16x128xf32, #tpu.memory_space<vmem>>, vector<2x128xf32>
    %cst_98 = arith.constant dense<0.000000e+00> : vector<2x128xf32>
    %285 = tpu.matmul %283, %171, %cst_98 {dimension_numbers = #tpu.dot_dimension_numbers<[1], [0], [0], [1], [0, 0, 1, 1], [], []>} : vector<2x32xf32>, vector<32x128xf32>, vector<2x128xf32> -> vector<2x128xf32>
    %286 = arith.addf %284, %285 : vector<2x128xf32>
    %287 = arith.negf %286 : vector<2x128xf32>
    %288 = math.exp %287 : vector<2x128xf32>
    %cst_99 = arith.constant 1.000000e+00 : f32
    %289 = vector.broadcast %cst_99 : f32 to vector<2x128xf32>
    %290 = arith.addf %289, %288 : vector<2x128xf32>
    %291 = arith.divf %289, %290 : vector<2x128xf32>
    %292 = math.tanh %286 : vector<2x128xf32>
    %293 = vector.extract_strided_slice %291 {offsets = [0, 0], sizes = [2, 32], strides = [1, 1]} : vector<2x128xf32> to vector<2x32xf32>
    %294 = vector.extract_strided_slice %291 {offsets = [0, 32], sizes = [2, 32], strides = [1, 1]} : vector<2x128xf32> to vector<2x32xf32>
    %295 = vector.extract_strided_slice %292 {offsets = [0, 64], sizes = [2, 32], strides = [1, 1]} : vector<2x128xf32> to vector<2x32xf32>
    %296 = vector.extract_strided_slice %291 {offsets = [0, 96], sizes = [2, 32], strides = [1, 1]} : vector<2x128xf32> to vector<2x32xf32>
    %297 = arith.mulf %294, %281 : vector<2x32xf32>
    %298 = arith.mulf %293, %295 : vector<2x32xf32>
    %299 = arith.addf %297, %298 : vector<2x32xf32>
    %300 = math.tanh %299 : vector<2x32xf32>
    %301 = arith.mulf %296, %300 : vector<2x32xf32>
    %c14_100 = arith.constant 14 : index
    %c0_101 = arith.constant 0 : index
    %302 = vector.load %arg12[%c14_100, %c0_101] : memref<16x128xf32, #tpu.memory_space<vmem>>, vector<2x128xf32>
    %cst_102 = arith.constant dense<0.000000e+00> : vector<2x128xf32>
    %303 = tpu.matmul %301, %171, %cst_102 {dimension_numbers = #tpu.dot_dimension_numbers<[1], [0], [0], [1], [0, 0, 1, 1], [], []>} : vector<2x32xf32>, vector<32x128xf32>, vector<2x128xf32> -> vector<2x128xf32>
    %304 = arith.addf %302, %303 : vector<2x128xf32>
    %305 = arith.negf %304 : vector<2x128xf32>
    %306 = math.exp %305 : vector<2x128xf32>
    %cst_103 = arith.constant 1.000000e+00 : f32
    %307 = vector.broadcast %cst_103 : f32 to vector<2x128xf32>
    %308 = arith.addf %307, %306 : vector<2x128xf32>
    %309 = arith.divf %307, %308 : vector<2x128xf32>
    %310 = math.tanh %304 : vector<2x128xf32>
    %311 = vector.extract_strided_slice %309 {offsets = [0, 0], sizes = [2, 32], strides = [1, 1]} : vector<2x128xf32> to vector<2x32xf32>
    %312 = vector.extract_strided_slice %309 {offsets = [0, 32], sizes = [2, 32], strides = [1, 1]} : vector<2x128xf32> to vector<2x32xf32>
    %313 = vector.extract_strided_slice %310 {offsets = [0, 64], sizes = [2, 32], strides = [1, 1]} : vector<2x128xf32> to vector<2x32xf32>
    %314 = vector.extract_strided_slice %309 {offsets = [0, 96], sizes = [2, 32], strides = [1, 1]} : vector<2x128xf32> to vector<2x32xf32>
    %315 = arith.mulf %312, %299 : vector<2x32xf32>
    %316 = arith.mulf %311, %313 : vector<2x32xf32>
    %317 = arith.addf %315, %316 : vector<2x32xf32>
    %318 = math.tanh %317 : vector<2x32xf32>
    %319 = arith.mulf %314, %318 : vector<2x32xf32>
    %c0_104 = arith.constant 0 : index
    %c0_105 = arith.constant 0 : index
    %320 = vector.load %arg9[%c0_104, %c0_105] : memref<32x5xf32, #tpu.memory_space<vmem>>, vector<32x5xf32>
    %cst_106 = arith.constant dense<0.000000e+00> : vector<2x5xf32>
    %321 = tpu.matmul %319, %320, %cst_106 {dimension_numbers = #tpu.dot_dimension_numbers<[1], [0], [0], [1], [0, 0, 1, 1], [], []>} : vector<2x32xf32>, vector<32x5xf32>, vector<2x5xf32> -> vector<2x5xf32>
    %c0_107 = arith.constant 0 : index
    %c0_108 = arith.constant 0 : index
    %322 = vector.load %arg10[%c0_107, %c0_108] : memref<1x5xf32, #tpu.memory_space<vmem>>, vector<1x5xf32>
    %323 = vector.broadcast %322 : vector<1x5xf32> to vector<2x5xf32>
    %324 = arith.addf %321, %323 : vector<2x5xf32>
    %c0_109 = arith.constant 0 : index
    %c0_110 = arith.constant 0 : index
    %325 = vector.load %arg11[%c0_109, %c0_110] : memref<2x5xf32, #tpu.memory_space<vmem>>, vector<2x5xf32>
    tpu.vector_store %arg11[%c0_109, %c0_110], %324 {strides = array<i32>} : memref<2x5xf32, #tpu.memory_space<vmem>>, vector<2x5xf32>,
    return
  }
}

</mosaic_0001>

<bundles_post_ra>
// kernel: tpu_custom_call.1
= control target key start
LH: loop header
LB: loop body
LE: loop exit
PB: predicated region body
PF: predicated region fallthrough
CT: control target
= control target key end

     0   :  { %16 = vsyncpa [#allocation5], 0  ;;  %s3156_s0 = inlined_call_operand.vmem [shape: f32[16,4], index: 0, kind: input, shape index: {}]   ;;  %s3157_s1 = inlined_call_operand.hbm [shape: f32[2,2,32], index: 1, kind: input, shape index: {}]   ;;  %s3158_s2 = inlined_call_operand.hbm [shape: f32[2,2,32], index: 2, kind: input, shape index: {}]   ;;  %s3159_s3 = inlined_call_operand.hbm [shape: f32[4,128], index: 3, kind: input, shape index: {}]   ;;  %s3160_s4 = inlined_call_operand.vmem [shape: f32[32,128], index: 4, kind: input, shape index: {}]   ;;  %s3161_s5 = inlined_call_operand.vmem [shape: f32[1,128], index: 5, kind: input, shape index: {}]   ;;  %s3162_s6 = inlined_call_operand.vmem [shape: f32[32,128], index: 6, kind: input, shape index: {}]   ;;  %s3163_s7 = inlined_call_operand.hbm [shape: f32[32,128], index: 7, kind: input, shape index: {}]   ;;  %s3164_s8 = inlined_call_operand.vmem [shape: f32[1,128], index: 8, kind: input, shape index: {}]   ;;  %s3165_s9 = inlined_call_operand.vmem [shape: f32[32,5], index: 9, kind: input, shape index: {}]   ;;  %s3166_s10 = inlined_call_operand.vmem [shape: f32[1,5], index: 10, kind: input, shape index: {}]   ;;  %s3167_s11 = inlined_call_operand.hbm [shape: f32[2,5], index: 11, kind: output, shape index: {}]  }
   0x1   :  { %17 = vsyncpa [#allocation8], 0 }
   0x2   :  { %18 = vsyncpa [#allocation11], 0 }
   0x3   :  { %19 = vsyncpa [#allocation6], 0  ;;  %s2753_s17 = smov [#allocation7]   ;;  %s2754_s19 = smov [#allocation4]  }
   0x4   :  { %s39_s18 = sshll.u32 %s2753_s17, 4  ;;  %s27_s20 = sshll.u32 %s2754_s19, 4  ;;  %s40_s18 = int_to_ptr.vmem [resolvable:$true] %s39_s18  ;;  %s2826_s20 = int_to_ptr.vmem [resolvable:$true] %s27_s20 }
   0x5   :  { %s2635_s23 = scalar_lea.hbm %s3158_s2, 64 }
   0x6   :  { %p2636_p0 = scmp.ne.s32.totalorder %s3158_s2, %s2635_s23  ;;  %p2639_p1 = scmp.lt.u32.totalorder %s2635_s23, %s3158_s2 }
   0x8   :  { %p2641_p2 = pnand %p2639_p1, %p2636_p0 }
   0xa   :  { %2644 = shalt.err (!%p2641_p2)
}
   0xb   :  { %s2645_s28 = scalar_lea.vmem %s40_s18, 64  ;;  %p2650_p4 = scmp.lt.s32.totalorder %s40_s18, %s40_s18 }
   0xc   :  { %p2646_p3 = scmp.ne.s32.totalorder %s40_s18, %s2645_s28  ;;  %p2651_p5 = scmp.lt.s32.totalorder %s2645_s28, %s2645_s28 }
   0xe   :  { %p2652_p6 = por %p2651_p5, %p2650_p4 }
  0x10   :  { %p2653_p7 = pnand %p2652_p6, %p2646_p3 }
  0x12   :  { %2656 = shalt.err (!%p2653_p7)
}
  0x13   :  { %s2755_s29 = smov 32   ;;  %s2756_s30 = smov 2  }
  0x14   :  { %45 = dma.hbm_to_vmem [thread:$0]  %s3158_s2, 64, %s40_s18, [#allocation8], %s2755_s29, %s2755_s29, %s2756_s30  }
  0x15   :  { %s2657_s16 = scalar_lea.hbm %s3157_s1, 64 }
  0x16   :  { %p2658_p8 = scmp.ne.s32.totalorder %s3157_s1, %s2657_s16  ;;  %p2661_p9 = scmp.lt.u32.totalorder %s2657_s16, %s3157_s1 }
  0x18   :  { %p2663_p10 = pnand %p2661_p9, %p2658_p8 }
  0x1a   :  { %2666 = shalt.err (!%p2663_p10)
}
  0x1b   :  { %s2667_s23 = scalar_lea.vmem %s2826_s20, 64  ;;  %p2672_p12 = scmp.lt.s32.totalorder %s2826_s20, %s2826_s20 }
  0x1c   :  { %p2668_p11 = scmp.ne.s32.totalorder %s2826_s20, %s2667_s23  ;;  %p2673_p13 = scmp.lt.s32.totalorder %s2667_s23, %s2667_s23 }
  0x1e   :  { %p2674_p0 = por %p2673_p13, %p2672_p12 }
  0x20   :  { %p2675_p1 = pnand %p2674_p0, %p2668_p11 }
  0x22   :  { %2678 = shalt.err (!%p2675_p1)
}
  0x23   :  { %33 = dma.hbm_to_vmem [thread:$0]  %s3157_s1, 64, %s2826_s20, [#allocation5], %s2755_s29, %s2755_s29, %s2756_s30  }
  0x24   :  { %s2757_s24 = smov [#allocation9]   ;;  %s2758_s26 = smov [#allocation10]  }
  0x25   :  { %s52_s25 = sshll.u32 %s2757_s24, 4  ;;  %s67_s27 = sshll.u32 %s2758_s26, 4  ;;  %s53_s25 = int_to_ptr.vmem [resolvable:$true] %s52_s25  ;;  %s2861_s27 = int_to_ptr.vmem [resolvable:$true] %s67_s27 }
  0x26   :  { %s2679_s13 = scalar_lea.hbm %s3159_s3, 64 }
  0x27   :  { %p2680_p2 = scmp.ne.s32.totalorder %s3159_s3, %s2679_s13  ;;  %p2683_p3 = scmp.lt.u32.totalorder %s2679_s13, %s3159_s3 }
  0x29   :  { %p2685_p4 = pnand %p2683_p3, %p2680_p2 }
  0x2b   :  { %2688 = shalt.err (!%p2685_p4)
}
  0x2c   :  { %s2689_s1 = scalar_lea.vmem %s53_s25, 64  ;;  %p2694_p6 = scmp.lt.s32.totalorder %s53_s25, %s53_s25 }
  0x2d   :  { %p2690_p5 = scmp.ne.s32.totalorder %s53_s25, %s2689_s1  ;;  %p2695_p7 = scmp.lt.s32.totalorder %s2689_s1, %s2689_s1 }
  0x2f   :  { %p2696_p8 = por %p2695_p7, %p2694_p6 }
  0x31   :  { %p2697_p9 = pnand %p2696_p8, %p2690_p5 }
  0x33   :  { %2700 = shalt.err (!%p2697_p9)
}
  0x34   :  { %55 = dma.hbm_to_vmem [thread:$0]  %s3159_s3, 64, %s53_s25, [#allocation8]  }
  0x35   :  { %s2701_s22 = scalar_lea.hbm %s3163_s7, 512 }
  0x36   :  { %p2702_p10 = scmp.ne.s32.totalorder %s3163_s7, %s2701_s22  ;;  %p2705_p11 = scmp.lt.u32.totalorder %s2701_s22, %s3163_s7 }
  0x38   :  { %p2707_p12 = pnand %p2705_p11, %p2702_p10 }
  0x3a   :  { %2710 = shalt.err (!%p2707_p12)
}
  0x3b   :  { %s2711_s26 = scalar_lea.vmem %s2861_s27, 512  ;;  %p2716_p0 = scmp.lt.s32.totalorder %s2861_s27, %s2861_s27 }
  0x3c   :  { %p2712_p13 = scmp.ne.s32.totalorder %s2861_s27, %s2711_s26  ;;  %p2717_p1 = scmp.lt.s32.totalorder %s2711_s26, %s2711_s26 }
  0x3e   :  { %p2718_p2 = por %p2717_p1, %p2716_p0 }
  0x40   :  { %p2719_p3 = pnand %p2718_p2, %p2712_p13 }
  0x42   :  { %2722 = shalt.err (!%p2719_p3)
}
  0x43   :  { %s2759_s3 = smov 128   ;;  %s2760_s25 = smov 8  }
  0x44   :  { %73 = dma.hbm_to_vmem [thread:$0]  %s3163_s7, 512, %s2861_s27, [#allocation11], %s2759_s3, %s2759_s3, %s2760_s25  }
  0x45   :  { %2745 = dma.done.wait [#allocation5], 64  }
  0x46   :  { %2746 = vsyncadd [#allocation5], 4294967232 }
  0x47   :  { %2747 = dma.done.wait [#allocation8], 128  }
  0x48   :  { %2748 = vsyncadd [#allocation8], 4294967168 }
  0x49   :  { %2749 = dma.done.wait [#allocation11], 512  }
  0x4a   :  { %2750 = vsyncadd [#allocation11], 4294966784  ;;  %v2761_v0 = vmov 0.0|0.0   ;;  %vm2762_vm0 = vmmov 0   ;;  %v2763_v1 = vmov 0.0   ;;  %vm109_vm1 = vcmask 1043456  }
  0x4b   :  { %2384 = vmatprep.subr.bf16.mxu1 %v2761_v0  ;;  %2194 = vmatprep.mubr.msk.f32.mxu1 %vm2762_vm0, %v2763_v1  ;;  %vm102_vm2 = vcmask 31744   ;;  %v94_v2 = vld [vmem:[#allocation9] sm:$0xf]  ;;  %v92_v3 = vld [vmem:[%s3156_s0] sm:$0xff]  ;;  %v93_v4 = vld [vmem:[%s3156_s0 + $0x8] sm:$0xff]  ;;  %vm197_vm3 = vcmask 261120  }
  0x4c   :  { %2181 = vmatprep.subr.msk.mxu0 %vm109_vm1, %v94_v2  ;;  %2183 = vmatprep.mubr.msk.f32.mxu0 %vm102_vm2, %v92_v3  ;;  %v190_v5 = vld [vmem:[%s3160_s4] sm:$0xff]  ;;  %v191_v6 = vld [vmem:[%s3160_s4 + $0x8] sm:$0xff]  ;;  %v192_v7 = vld [vmem:[%s3160_s4 + $0x10] sm:$0xff]  ;;  %s2764_s22 = smov 64   ;;  %vm304_vm4 = vcmask 254976   ;;  %vm2027_vm5 = vcmask 33792  }
  0x4d   :  { %2182 = vmatpush3.msk.msra.mxu0 %vm109_vm1, %v94_v2  ;;  %v2910_v8 = vpack.c.bf16 %v191_v6, %v190_v5  ;;  %v193_v9 = vld [vmem:[%s3160_s4 + $0x18] sm:$0xff]  ;;  %v194_v11 = vld [vmem:[#allocation4] sm:$0x3]  ;;  %v2046_v12 = vld [vmem:[%s3161_s5] ss:$0 sm:$0xff] }
  0x4e   :  { %2184 = vmatmul.mubr.msk.f32.vlgmr.msra.gmra.mrb[0].mxu0 %vm102_vm2, %v93_v4  ;;  %2390 = vmatprep.subr.bf16.mxu0 %v2761_v0  ;;  %v2917_v10 = vpack.c.bf16 %v193_v9, %v192_v7  ;;  %v195_v22 = vld [vmem:[#allocation7] sm:$0x3] }
  0x4f   :  { %2386 = vmatpush3.bf16.msra.mxu1 %v2910_v8  ;;  %2392 = vmatpush3.bf16.msra.mxu0 %v2910_v8 }
  0x50   :  { %2387 = vmatprep.subr.bf16.mxu1 %v2761_v0  ;;  %2393 = vmatprep.subr.bf16.mxu0 %v2761_v0 }
  0x51   :  { %2205 = vmatprep.mubr.msk.f32.mxu0 %vm2762_vm0, %v2763_v1 }
  0x53   :  { %2389 = vmatpush3.bf16.msra.mxu1 %v2917_v10  ;;  %2395 = vmatpush3.bf16.msra.mxu0 %v2917_v10 }
  0x54   :  { %2396 = vmatprep.subr.bf16.mxu1 %v2761_v0  ;;  %2402 = vmatprep.subr.bf16.mxu0 %v2761_v0 }
  0x56   :  { %2195 = vmatmul.mubr.msk.f32.vlgmr.msra.gmra.mrb[0].mxu1 %vm197_vm3, %v194_v11 }
  0x57   :  { %2398 = vmatpush3.bf16.msra.mxu1 %v2910_v8  ;;  %2216 = vmatprep.mubr.msk.f32.mxu1 %vm2762_vm0, %v2763_v1 }
  0x58   :  { %2399 = vmatprep.subr.bf16.mxu1 %v2761_v0 }
  0x5b   :  { %2401 = vmatpush3.bf16.msra.mxu1 %v2917_v10 }
  0x5c   :  { %2408 = vmatprep.subr.bf16.mxu1 %v2761_v0 }
 0x121   :  { %v2185_v13 = vpop.f32.mrb[0].mxu0 }
 0x122   :  { %v185_v14 = vadd.f32 %v2185_v13, %v2046_v12  ;;  %v179_v15 = vpop.f32.mrb[1].mxu0 }
 0x123   :  { %v180_v16 = vadd.f32 %v2046_v12, %v179_v15 }
 0x124   :  { %189 = vst [vmem:[#allocation2 + $0x8] sm:$0xff] %v185_v14 }
 0x125   :  { %188 = vst [vmem:[#allocation2] sm:$0xff] %v180_v16 }
 0x129   :  { %v267_v17 = vpop.f32.mrb[0].mxu1 }
 0x12a   :  { %v2196_v18 = vpop.f32.mrb[1].mxu1 }
 0x12c   :  { %v196_v19 = vld [vmem:[#allocation2] sm:$0x3]  ;;  %v306_v37 = vld [vmem:[#allocation2 + $0x2] sm:$0x3]  ;;  %v409_v55 = vld [vmem:[#allocation2 + $0x4] sm:$0x3] }
 0x12d   :  { %v271_v20 = vadd.f32 %v267_v17, %v196_v19  ;;  %v512_v13 = vld [vmem:[#allocation2 + $0x6] sm:$0x3] }
 0x12f   :  { %2507 = vtanh.f32 %v271_v20  ;;  %v2051_v23 = vmul.f32 -1.442695, %v271_v20 }
 0x131   :  { %2509 = vpow2.f32 %v2051_v23 }
 0x139   :  { %v2508_v21 = vpop.eup %2507 }
 0x13a   :  { %285 = vrot.lane.b32.xlu0 %v2508_v21, %s2764_s22 }
 0x13b   :  { %v2510_v24 = vpop.eup %2509 }
 0x13c   :  { %v275_v25 = vadd.f32 1.0, %v2510_v24 }
 0x13e   :  { %280 = vrot.lane.b32.xlu0 %v195_v22, %s2755_s29  ;;  %2511 = vrcp.f32 %v275_v25 }
 0x148   :  { %v2512_v26 = vpop.eup %2511 }
 0x1ac   :  { %v286_v27 = vpop.permute.xlu0 %285 }
 0x1ad   :  { %v288_v28 = vmul.f32 %v2512_v26, %v286_v27 }
 0x1af   :  { %290 = vrot.lane.b32.xlu1 %v288_v28, %s2755_s29 }
 0x1b0   :  { %v281_v29 = vpop.permute.xlu0 %280 }
 0x1b1   :  { %v283_v30 = vmul.f32 %v2512_v26, %v281_v29 }
 0x221   :  { %v291_v31 = vpop.permute.xlu1 %290 }
 0x222   :  { %v293_v32 = vadd.f32 %v291_v31, %v283_v30  ;;  %v615_v31 = vld [vmem:[#allocation2 + $0x8] sm:$0x3] }
 0x224   :  { %2513 = vtanh.f32 %v293_v32 }
 0x22e   :  { %v2514_v33 = vpop.eup %2513 }
 0x22f   :  { %296 = vrot.lane.b32.xlu1 %v2514_v33, %s2764_s22 }
 0x2a1   :  { %v297_v34 = vpop.permute.xlu1 %296 }
 0x2a2   :  { %v299_v35 = vmul.f32 %v2512_v26, %v297_v34 }
 0x2a4   :  { %301 = vrot.lane.b32.xlu0 %v299_v35, %s2755_s29 }
 0x316   :  { %v302_v36 = vpop.permute.xlu0 %301 }
 0x317   :  { %305 = vst.msk [vmem:[#allocation3] sm:$0x3] %vm304_vm4, %v302_v36  ;;  %2206 = vmatmul.mubr.msk.f32.vlgmr.msra.gmra.mrb[2].mxu0 %vm197_vm3, %v302_v36 }
 0x318   :  { %2404 = vmatpush3.bf16.msra.mxu0 %v2910_v8  ;;  %2227 = vmatprep.mubr.msk.f32.mxu0 %vm2762_vm0, %v2763_v1 }
 0x319   :  { %2405 = vmatprep.subr.bf16.mxu0 %v2761_v0 }
 0x31c   :  { %2407 = vmatpush3.bf16.msra.mxu0 %v2917_v10 }
 0x31d   :  { %2414 = vmatprep.subr.bf16.mxu0 %v2761_v0 }
 0x3ea   :  { %v375_v38 = vpop.f32.mrb[2].mxu0 }
 0x3eb   :  { %v379_v39 = vadd.f32 %v375_v38, %v306_v37  ;;  %v2207_v40 = vpop.f32.mrb[3].mxu0 }
 0x3ed   :  { %2515 = vtanh.f32 %v379_v39  ;;  %v2053_v42 = vmul.f32 -1.442695, %v379_v39 }
 0x3ef   :  { %2517 = vpow2.f32 %v2053_v42 }
 0x3f7   :  { %v2516_v41 = vpop.eup %2515 }
 0x3f8   :  { %389 = vrot.lane.b32.xlu1 %v2516_v41, %s2764_s22 }
 0x3f9   :  { %v2518_v43 = vpop.eup %2517 }
 0x3fa   :  { %v383_v44 = vadd.f32 1.0, %v2518_v43 }
 0x3fc   :  { %2519 = vrcp.f32 %v383_v44 }
 0x406   :  { %v2520_v45 = vpop.eup %2519 }
 0x407   :  { %v387_v48 = vmul.f32 %v2520_v45, %v293_v32 }
 0x46a   :  { %v390_v46 = vpop.permute.xlu1 %389 }
 0x46b   :  { %v392_v47 = vmul.f32 %v2520_v45, %v390_v46 }
 0x46d   :  { %394 = vrot.lane.b32.xlu0 %v392_v47, %s2755_s29 }
 0x4df   :  { %v395_v49 = vpop.permute.xlu0 %394 }
 0x4e0   :  { %v397_v50 = vadd.f32 %v395_v49, %v387_v48  ;;  %v718_v49 = vld [vmem:[#allocation2 + $0xa] sm:$0x3] }
 0x4e2   :  { %2521 = vtanh.f32 %v397_v50 }
 0x4ec   :  { %v2522_v51 = vpop.eup %2521 }
 0x4ed   :  { %400 = vrot.lane.b32.xlu1 %v2522_v51, %s2764_s22 }
 0x55f   :  { %v401_v52 = vpop.permute.xlu1 %400 }
 0x560   :  { %v403_v53 = vmul.f32 %v2520_v45, %v401_v52 }
 0x562   :  { %405 = vrot.lane.b32.xlu0 %v403_v53, %s2755_s29 }
 0x5d4   :  { %v406_v54 = vpop.permute.xlu0 %405 }
 0x5d5   :  { %408 = vst.msk [vmem:[#allocation3 + $0x2] sm:$0x3] %vm304_vm4, %v406_v54  ;;  %2217 = vmatmul.mubr.msk.f32.vlgmr.msra.gmra.mrb[2].mxu1 %vm197_vm3, %v406_v54 }
 0x5d6   :  { %2410 = vmatpush3.bf16.msra.mxu1 %v2910_v8  ;;  %2238 = vmatprep.mubr.msk.f32.mxu1 %vm2762_vm0, %v2763_v1 }
 0x5d7   :  { %2411 = vmatprep.subr.bf16.mxu1 %v2761_v0 }
 0x5da   :  { %2413 = vmatpush3.bf16.msra.mxu1 %v2917_v10 }
 0x5db   :  { %2420 = vmatprep.subr.bf16.mxu1 %v2761_v0 }
 0x6a8   :  { %v478_v56 = vpop.f32.mrb[2].mxu1 }
 0x6a9   :  { %v482_v57 = vadd.f32 %v478_v56, %v409_v55  ;;  %v2218_v58 = vpop.f32.mrb[3].mxu1 }
 0x6ab   :  { %2523 = vtanh.f32 %v482_v57  ;;  %v2055_v60 = vmul.f32 -1.442695, %v482_v57 }
 0x6ad   :  { %2525 = vpow2.f32 %v2055_v60 }
 0x6b5   :  { %v2524_v59 = vpop.eup %2523 }
 0x6b6   :  { %492 = vrot.lane.b32.xlu1 %v2524_v59, %s2764_s22 }
 0x6b7   :  { %v2526_v61 = vpop.eup %2525 }
 0x6b8   :  { %v486_v62 = vadd.f32 1.0, %v2526_v61 }
 0x6ba   :  { %2527 = vrcp.f32 %v486_v62 }
 0x6c4   :  { %v2528_v63 = vpop.eup %2527 }
 0x6c5   :  { %v490_v4 = vmul.f32 %v2528_v63, %v397_v50 }
 0x728   :  { %v493_v2 = vpop.permute.xlu1 %492 }
 0x729   :  { %v495_v3 = vmul.f32 %v2528_v63, %v493_v2 }
 0x72b   :  { %497 = vrot.lane.b32.xlu0 %v495_v3, %s2755_s29 }
 0x79d   :  { %v498_v5 = vpop.permute.xlu0 %497 }
 0x79e   :  { %v500_v6 = vadd.f32 %v498_v5, %v490_v4  ;;  %v821_v4 = vld [vmem:[#allocation2 + $0xc] sm:$0x3] }
 0x7a0   :  { %2529 = vtanh.f32 %v500_v6 }
 0x7aa   :  { %v2530_v7 = vpop.eup %2529 }
 0x7ab   :  { %503 = vrot.lane.b32.xlu1 %v2530_v7, %s2764_s22 }
 0x81d   :  { %v504_v9 = vpop.permute.xlu1 %503 }
 0x81e   :  { %v506_v11 = vmul.f32 %v2528_v63, %v504_v9 }
 0x820   :  { %508 = vrot.lane.b32.xlu0 %v506_v11, %s2755_s29 }
 0x892   :  { %v509_v12 = vpop.permute.xlu0 %508 }
 0x893   :  { %511 = vst.msk [vmem:[#allocation3 + $0x4] sm:$0x3] %vm304_vm4, %v509_v12  ;;  %2228 = vmatmul.mubr.msk.f32.vlgmr.msra.gmra.mrb[4].mxu0 %vm197_vm3, %v509_v12 }
 0x894   :  { %2416 = vmatpush3.bf16.msra.mxu0 %v2910_v8  ;;  %2249 = vmatprep.mubr.msk.f32.mxu0 %vm2762_vm0, %v2763_v1 }
 0x895   :  { %2417 = vmatprep.subr.bf16.mxu0 %v2761_v0 }
 0x898   :  { %2419 = vmatpush3.bf16.msra.mxu0 %v2917_v10 }
 0x899   :  { %2426 = vmatprep.subr.bf16.mxu0 %v2761_v0 }
 0x966   :  { %v581_v14 = vpop.f32.mrb[4].mxu0 }
 0x967   :  { %v585_v15 = vadd.f32 %v581_v14, %v512_v13  ;;  %v2229_v16 = vpop.f32.mrb[5].mxu0 }
 0x969   :  { %2531 = vtanh.f32 %v585_v15  ;;  %v2057_v18 = vmul.f32 -1.442695, %v585_v15 }
 0x96b   :  { %2533 = vpow2.f32 %v2057_v18 }
 0x973   :  { %v2532_v17 = vpop.eup %2531 }
 0x974   :  { %595 = vrot.lane.b32.xlu1 %v2532_v17, %s2764_s22 }
 0x975   :  { %v2534_v19 = vpop.eup %2533 }
 0x976   :  { %v589_v20 = vadd.f32 1.0, %v2534_v19 }
 0x978   :  { %2535 = vrcp.f32 %v589_v20 }
 0x982   :  { %v2536_v21 = vpop.eup %2535 }
 0x983   :  { %v593_v24 = vmul.f32 %v2536_v21, %v500_v6 }
 0x9e6   :  { %v596_v22 = vpop.permute.xlu1 %595 }
 0x9e7   :  { %v598_v23 = vmul.f32 %v2536_v21, %v596_v22 }
 0x9e9   :  { %600 = vrot.lane.b32.xlu0 %v598_v23, %s2755_s29 }
 0xa5b   :  { %v601_v25 = vpop.permute.xlu0 %600 }
 0xa5c   :  { %v603_v26 = vadd.f32 %v601_v25, %v593_v24  ;;  %v924_v24 = vld [vmem:[#allocation2 + $0xe] sm:$0x3] }
 0xa5e   :  { %2537 = vtanh.f32 %v603_v26 }
 0xa68   :  { %v2538_v27 = vpop.eup %2537 }
 0xa69   :  { %606 = vrot.lane.b32.xlu1 %v2538_v27, %s2764_s22 }
 0xadb   :  { %v607_v28 = vpop.permute.xlu1 %606 }
 0xadc   :  { %v609_v29 = vmul.f32 %v2536_v21, %v607_v28 }
 0xade   :  { %611 = vrot.lane.b32.xlu0 %v609_v29, %s2755_s29 }
 0xb50   :  { %v612_v30 = vpop.permute.xlu0 %611 }
 0xb51   :  { %614 = vst.msk [vmem:[#allocation3 + $0x6] sm:$0x3] %vm304_vm4, %v612_v30  ;;  %2239 = vmatmul.mubr.msk.f32.vlgmr.msra.gmra.mrb[4].mxu1 %vm197_vm3, %v612_v30 }
 0xb52   :  { %2422 = vmatpush3.bf16.msra.mxu1 %v2910_v8  ;;  %2260 = vmatprep.mubr.msk.f32.mxu1 %vm2762_vm0, %v2763_v1 }
 0xb53   :  { %2423 = vmatprep.subr.bf16.mxu1 %v2761_v0 }
 0xb56   :  { %2425 = vmatpush3.bf16.msra.mxu1 %v2917_v10 }
 0xb58   :  { %v1027_v3 = vld [vmem:[#allocation3] sm:$0xff] }
 0xc24   :  { %v684_v32 = vpop.f32.mrb[4].mxu1 }
 0xc25   :  { %v688_v33 = vadd.f32 %v684_v32, %v615_v31  ;;  %v2240_v34 = vpop.f32.mrb[5].mxu1 }
 0xc27   :  { %2539 = vtanh.f32 %v688_v33  ;;  %v2059_v36 = vmul.f32 -1.442695, %v688_v33 }
 0xc29   :  { %2541 = vpow2.f32 %v2059_v36 }
 0xc31   :  { %v2540_v35 = vpop.eup %2539 }
 0xc32   :  { %698 = vrot.lane.b32.xlu1 %v2540_v35, %s2764_s22 }
 0xc33   :  { %v2542_v37 = vpop.eup %2541 }
 0xc34   :  { %v692_v38 = vadd.f32 1.0, %v2542_v37 }
 0xc36   :  { %2543 = vrcp.f32 %v692_v38 }
 0xc40   :  { %v2544_v39 = vpop.eup %2543 }
 0xc41   :  { %v696_v42 = vmul.f32 %v2544_v39, %v603_v26 }
 0xca4   :  { %v699_v40 = vpop.permute.xlu1 %698 }
 0xca5   :  { %v701_v41 = vmul.f32 %v2544_v39, %v699_v40  ;;  %v1030_v40 = vld [vmem:[%s3162_s6 + $0x8] sm:$0xff] }
 0xca7   :  { %703 = vrot.lane.b32.xlu0 %v701_v41, %s2755_s29 }
 0xd19   :  { %v704_v43 = vpop.permute.xlu0 %703 }
 0xd1a   :  { %v706_v44 = vadd.f32 %v704_v43, %v696_v42  ;;  %v1031_v42 = vld [vmem:[%s3162_s6 + $0x10] sm:$0xff]  ;;  %v1032_v43 = vld [vmem:[%s3162_s6 + $0x18] sm:$0xff] }
 0xd1c   :  { %2545 = vtanh.f32 %v706_v44 }
 0xd26   :  { %v2546_v45 = vpop.eup %2545 }
 0xd27   :  { %709 = vrot.lane.b32.xlu1 %v2546_v45, %s2764_s22  ;;  %v1123_v45 = vld [vmem:[#allocation10] sm:$0xff] }
 0xd99   :  { %v710_v46 = vpop.permute.xlu1 %709 }
 0xd9a   :  { %v712_v47 = vmul.f32 %v2544_v39, %v710_v46  ;;  %v1029_v39 = vld [vmem:[%s3162_s6] sm:$0xff] }
 0xd9b   :  { %v2432_v41 = vpack.c.bf16 %v1030_v40, %v1029_v39  ;;  %v1124_v46 = vld [vmem:[#allocation10 + $0x8] sm:$0xff] }
 0xd9c   :  { %714 = vrot.lane.b32.xlu0 %v712_v47, %s2755_s29  ;;  %v1125_v47 = vld [vmem:[#allocation10 + $0x10] sm:$0xff] }
 0xd9d   :  { %2433 = vmatprep.subr.bf16.mxu1 %v2432_v41 }
 0xe0e   :  { %v715_v48 = vpop.permute.xlu0 %714 }
 0xe0f   :  { %717 = vst.msk [vmem:[#allocation3 + $0x8] sm:$0x3] %vm304_vm4, %v715_v48  ;;  %2250 = vmatmul.mubr.msk.f32.vlgmr.msra.gmra.mrb[6].mxu0 %vm197_vm3, %v715_v48  ;;  %v3029_v48 = vpack.c.bf16 %v1124_v46, %v1123_v45 }
 0xe10   :  { %2428 = vmatpush3.bf16.msra.mxu0 %v2910_v8  ;;  %2271 = vmatprep.mubr.msk.f32.mxu0 %vm2762_vm0, %v2763_v1 }
 0xe11   :  { %2429 = vmatprep.subr.bf16.mxu0 %v2761_v0 }
 0xe14   :  { %2431 = vmatpush3.bf16.msra.mxu0 %v2917_v10 }
 0xe15   :  { %2440 = vmatprep.subr.bf16.mxu0 %v2761_v0 }
 0xee2   :  { %v787_v50 = vpop.f32.mrb[6].mxu0 }
 0xee3   :  { %v791_v51 = vadd.f32 %v787_v50, %v718_v49  ;;  %v2251_v52 = vpop.f32.mrb[7].mxu0  ;;  %v1126_v49 = vld [vmem:[#allocation10 + $0x18] sm:$0xff] }
 0xee4   :  { %v3032_v52 = vpack.c.bf16 %v1126_v49, %v1125_v47 }
 0xee5   :  { %2547 = vtanh.f32 %v791_v51  ;;  %v2061_v54 = vmul.f32 -1.442695, %v791_v51 }
 0xee7   :  { %2549 = vpow2.f32 %v2061_v54  ;;  %v1128_v54 = vld [vmem:[#allocation4 + $0x2] sm:$0x3] }
 0xeef   :  { %v2548_v53 = vpop.eup %2547 }
 0xef0   :  { %801 = vrot.lane.b32.xlu1 %v2548_v53, %s2764_s22  ;;  %v1130_v53 = vld [vmem:[#allocation7 + $0x2] sm:$0x3] }
 0xef1   :  { %v2550_v8 = vpop.eup %2549 }
 0xef2   :  { %v795_v55 = vadd.f32 1.0, %v2550_v8 }
 0xef4   :  { %2551 = vrcp.f32 %v795_v55 }
 0xefe   :  { %v2552_v56 = vpop.eup %2551 }
 0xeff   :  { %v799_v10 = vmul.f32 %v2552_v56, %v706_v44  ;;  %v2436_v44 = vpack.c.bf16 %v1032_v43, %v1031_v42 }
 0xf62   :  { %v802_v57 = vpop.permute.xlu1 %801 }
 0xf63   :  { %v804_v58 = vmul.f32 %v2552_v56, %v802_v57 }
 0xf65   :  { %806 = vrot.lane.b32.xlu0 %v804_v58, %s2755_s29  ;;  %v2066_v58 = vld [vmem:[%s3164_s8] ss:$0 sm:$0xff] }
 0xfd7   :  { %v807_v59 = vpop.permute.xlu0 %806 }
 0xfd8   :  { %v809_v60 = vadd.f32 %v807_v59, %v799_v10 }
 0xfda   :  { %2553 = vtanh.f32 %v809_v60 }
 0xfe4   :  { %v2554_v61 = vpop.eup %2553 }
 0xfe5   :  { %812 = vrot.lane.b32.xlu1 %v2554_v61, %s2764_s22 }
0x1057   :  { %v813_v62 = vpop.permute.xlu1 %812 }
0x1058   :  { %v815_v63 = vmul.f32 %v2552_v56, %v813_v62 }
0x105a   :  { %817 = vrot.lane.b32.xlu0 %v815_v63, %s2755_s29 }
0x10cc   :  { %v818_v2 = vpop.permute.xlu0 %817 }
0x10cd   :  { %820 = vst.msk [vmem:[#allocation3 + $0xa] sm:$0x3] %vm304_vm4, %v818_v2  ;;  %2261 = vmatmul.mubr.msk.f32.vlgmr.msra.gmra.mrb[6].mxu1 %vm197_vm3, %v818_v2 }
0x10ce   :  { %2282 = vmatprep.mubr.msk.f32.mxu1 %vm197_vm3, %v1027_v3  ;;  %2435 = vmatpush3.bf16.msra.mxu1 %v2432_v41 }
0x10cf   :  { %2437 = vmatprep.subr.bf16.mxu1 %v2436_v44 }
0x10d2   :  { %2439 = vmatpush3.bf16.msra.mxu1 %v2436_v44 }
0x10d3   :  { %2446 = vmatprep.subr.bf16.mxu1 %v2761_v0 }
0x11a0   :  { %v890_v5 = vpop.f32.mrb[6].mxu1 }
0x11a1   :  { %v894_v6 = vadd.f32 %v890_v5, %v821_v4  ;;  %v2262_v7 = vpop.f32.mrb[7].mxu1 }
0x11a3   :  { %2555 = vtanh.f32 %v894_v6  ;;  %v2063_v11 = vmul.f32 -1.442695, %v894_v6 }
0x11a5   :  { %2557 = vpow2.f32 %v2063_v11 }
0x11ad   :  { %v2556_v9 = vpop.eup %2555 }
0x11ae   :  { %904 = vrot.lane.b32.xlu1 %v2556_v9, %s2764_s22 }
0x11af   :  { %v2558_v12 = vpop.eup %2557 }
0x11b0   :  { %v898_v13 = vadd.f32 1.0, %v2558_v12 }
0x11b2   :  { %2559 = vrcp.f32 %v898_v13 }
0x11bc   :  { %v2560_v14 = vpop.eup %2559 }
0x11bd   :  { %v902_v17 = vmul.f32 %v2560_v14, %v809_v60 }
0x1220   :  { %v905_v15 = vpop.permute.xlu1 %904 }
0x1221   :  { %v907_v16 = vmul.f32 %v2560_v14, %v905_v15 }
0x1223   :  { %909 = vrot.lane.b32.xlu0 %v907_v16, %s2755_s29 }
0x1295   :  { %v910_v18 = vpop.permute.xlu0 %909 }
0x1296   :  { %v912_v19 = vadd.f32 %v910_v18, %v902_v17 }
0x1298   :  { %2561 = vtanh.f32 %v912_v19 }
0x12a2   :  { %v2562_v20 = vpop.eup %2561 }
0x12a3   :  { %915 = vrot.lane.b32.xlu1 %v2562_v20, %s2764_s22 }
0x1315   :  { %v916_v21 = vpop.permute.xlu1 %915 }
0x1316   :  { %v918_v22 = vmul.f32 %v2560_v14, %v916_v21 }
0x1318   :  { %920 = vrot.lane.b32.xlu0 %v918_v22, %s2755_s29 }
0x138a   :  { %v921_v23 = vpop.permute.xlu0 %920 }
0x138b   :  { %923 = vst.msk [vmem:[#allocation3 + $0xc] sm:$0x3] %vm304_vm4, %v921_v23  ;;  %2272 = vmatmul.mubr.msk.f32.vlgmr.msra.gmra.mrb[8].mxu0 %vm197_vm3, %v921_v23 }
0x138c   :  { %2293 = vmatprep.mubr.msk.f32.mxu0 %vm2762_vm0, %v2763_v1  ;;  %2442 = vmatpush3.bf16.msra.mxu0 %v3029_v48 }
0x138d   :  { %2443 = vmatprep.subr.bf16.mxu0 %v2761_v0 }
0x1390   :  { %2445 = vmatpush3.bf16.msra.mxu0 %v3032_v52 }
0x1391   :  { %2452 = vmatprep.subr.bf16.mxu0 %v2761_v0 }
0x1393   :  { %2294 = vmatmul.mubr.msk.f32.vlgmr.msra.gmra.mrb[10].mxu0 %vm197_vm3, %v1128_v54 }
0x1394   :  { %2454 = vmatpush3.bf16.msra.mxu0 %v3029_v48  ;;  %2315 = vmatprep.mubr.msk.f32.mxu0 %vm2762_vm0, %v2763_v1 }
0x1395   :  { %2455 = vmatprep.subr.bf16.mxu0 %v2761_v0 }
0x1398   :  { %2457 = vmatpush3.bf16.msra.mxu0 %v3032_v52 }
0x1399   :  { %2464 = vmatprep.subr.bf16.mxu0 %v2761_v0 }
0x145e   :  { %v993_v25 = vpop.f32.mrb[8].mxu0 }
0x145f   :  { %v997_v26 = vadd.f32 %v993_v25, %v924_v24  ;;  %v2273_v27 = vpop.f32.mrb[9].mxu0 }
0x1461   :  { %2563 = vtanh.f32 %v997_v26  ;;  %v2065_v29 = vmul.f32 -1.442695, %v997_v26 }
0x1463   :  { %2565 = vpow2.f32 %v2065_v29 }
0x1466   :  { %v1201_v56 = vpop.f32.mrb[10].mxu0 }
0x1467   :  { %v2295_v57 = vpop.f32.mrb[11].mxu0 }
0x146b   :  { %v2564_v28 = vpop.eup %2563 }
0x146c   :  { %1007 = vrot.lane.b32.xlu1 %v2564_v28, %s2764_s22 }
0x146d   :  { %v2566_v30 = vpop.eup %2565 }
0x146e   :  { %v1001_v31 = vadd.f32 1.0, %v2566_v30 }
0x1470   :  { %2567 = vrcp.f32 %v1001_v31 }
0x147a   :  { %v2568_v32 = vpop.eup %2567 }
0x147b   :  { %v1005_v35 = vmul.f32 %v2568_v32, %v912_v19 }
0x14de   :  { %v1008_v33 = vpop.permute.xlu1 %1007 }
0x14df   :  { %v1010_v34 = vmul.f32 %v2568_v32, %v1008_v33 }
0x14e1   :  { %1012 = vrot.lane.b32.xlu0 %v1010_v34, %s2755_s29 }
0x1553   :  { %v1013_v36 = vpop.permute.xlu0 %1012 }
0x1554   :  { %v1015_v37 = vadd.f32 %v1013_v36, %v1005_v35 }
0x1556   :  { %2569 = vtanh.f32 %v1015_v37 }
0x1560   :  { %v2570_v38 = vpop.eup %2569 }
0x1561   :  { %1018 = vrot.lane.b32.xlu1 %v2570_v38, %s2764_s22 }
0x15d3   :  { %v1019_v50 = vpop.permute.xlu1 %1018 }
0x15d4   :  { %v1021_v51 = vmul.f32 %v2568_v32, %v1019_v50 }
0x15d6   :  { %1023 = vrot.lane.b32.xlu0 %v1021_v51, %s2755_s29 }
0x15da   :  { %1214 = vrot.lane.b32.xlu0 %v1130_v53, %s2755_s29 }
0x1648   :  { %v1024_v8 = vpop.permute.xlu0 %1023 }
0x1649   :  { %1026 = vst.msk [vmem:[#allocation3 + $0xe] sm:$0x3] %vm304_vm4, %v1024_v8 }
0x164c   :  { %v1215_v11 = vpop.permute.xlu0 %1214 }
0x1650   :  { %v1028_v55 = vld [vmem:[#allocation3 + $0x8] sm:$0xff] }
0x1651   :  { %2283 = vmatmul.mubr.msk.f32.vlgmr.msra.gmra.mrb[8].mxu1 %vm197_vm3, %v1028_v55 }
0x1652   :  { %2448 = vmatpush3.bf16.msra.mxu1 %v3029_v48  ;;  %2304 = vmatprep.mubr.msk.f32.mxu1 %vm2762_vm0, %v2763_v1 }
0x1653   :  { %2449 = vmatprep.subr.bf16.mxu1 %v2761_v0 }
0x1656   :  { %2451 = vmatpush3.bf16.msra.mxu1 %v3032_v52 }
0x1657   :  { %2458 = vmatprep.subr.bf16.mxu1 %v2761_v0 }
0x1724   :  { %v2284_v10 = vpop.f32.mrb[8].mxu1 }
0x1725   :  { %v1118_v59 = vadd.f32 %v2284_v10, %v2066_v58  ;;  %v1112_v60 = vpop.f32.mrb[9].mxu1 }
0x1726   :  { %v1113_v61 = vadd.f32 %v2066_v58, %v1112_v60 }
0x1727   :  { %1122 = vst [vmem:[#allocation2 + $0x8] sm:$0xff] %v1118_v59 }
0x1728   :  { %1121 = vst [vmem:[#allocation2] sm:$0xff] %v1113_v61 }
0x172f   :  { %v1131_v62 = vld [vmem:[#allocation2] sm:$0x3]  ;;  %v1234_v19 = vld [vmem:[#allocation2 + $0x2] sm:$0x3]  ;;  %v1335_v37 = vld [vmem:[#allocation2 + $0x4] sm:$0x3] }
0x1730   :  { %v1205_v63 = vadd.f32 %v1201_v56, %v1131_v62  ;;  %v1436_v56 = vld [vmem:[#allocation2 + $0x6] sm:$0x3] }
0x1732   :  { %2571 = vtanh.f32 %v1205_v63  ;;  %v2070_v3 = vmul.f32 -1.442695, %v1205_v63 }
0x1734   :  { %2573 = vpow2.f32 %v2070_v3 }
0x173c   :  { %v2572_v2 = vpop.eup %2571 }
0x173d   :  { %1219 = vrot.lane.b32.xlu1 %v2572_v2, %s2764_s22 }
0x173e   :  { %v2574_v4 = vpop.eup %2573 }
0x173f   :  { %v1209_v5 = vadd.f32 1.0, %v2574_v4 }
0x1741   :  { %2575 = vrcp.f32 %v1209_v5 }
0x174b   :  { %v2576_v6 = vpop.eup %2575 }
0x174c   :  { %v1217_v12 = vmul.f32 %v2576_v6, %v1215_v11 }
0x17af   :  { %v1220_v7 = vpop.permute.xlu1 %1219 }
0x17b0   :  { %v1222_v9 = vmul.f32 %v2576_v6, %v1220_v7 }
0x17b2   :  { %1224 = vrot.lane.b32.xlu1 %v1222_v9, %s2755_s29 }
0x1824   :  { %v1225_v13 = vpop.permute.xlu1 %1224 }
0x1825   :  { %v1227_v14 = vadd.f32 %v1225_v13, %v1217_v12  ;;  %v1537_v13 = vld [vmem:[#allocation2 + $0x8] sm:$0x3] }
0x1827   :  { %2577 = vtanh.f32 %v1227_v14 }
0x1831   :  { %v2578_v15 = vpop.eup %2577 }
0x1832   :  { %1230 = vrot.lane.b32.xlu0 %v2578_v15, %s2764_s22 }
0x18a4   :  { %v1231_v16 = vpop.permute.xlu0 %1230 }
0x18a5   :  { %v1233_v17 = vmul.f32 %v2576_v6, %v1231_v16 }
0x18a7   :  { %1236 = vrot.lane.b32.xlu1 %v1233_v17, %s2755_s29 }
0x1919   :  { %v1237_v18 = vpop.permute.xlu1 %1236 }
0x191a   :  { %2305 = vmatmul.mubr.msk.f32.vlgmr.msra.gmra.mrb[10].mxu1 %vm197_vm3, %v1237_v18 }
0x191b   :  { %2460 = vmatpush3.bf16.msra.mxu1 %v3029_v48  ;;  %2326 = vmatprep.mubr.msk.f32.mxu1 %vm2762_vm0, %v2763_v1 }
0x191c   :  { %2461 = vmatprep.subr.bf16.mxu1 %v2761_v0 }
0x191f   :  { %2463 = vmatpush3.bf16.msra.mxu1 %v3032_v52 }
0x1920   :  { %2470 = vmatprep.subr.bf16.mxu1 %v2761_v0 }
0x19ed   :  { %v1306_v20 = vpop.f32.mrb[10].mxu1 }
0x19ee   :  { %v1310_v21 = vadd.f32 %v1306_v20, %v1234_v19  ;;  %v2306_v22 = vpop.f32.mrb[11].mxu1 }
0x19f0   :  { %2579 = vtanh.f32 %v1310_v21  ;;  %v2072_v24 = vmul.f32 -1.442695, %v1310_v21 }
0x19f2   :  { %2581 = vpow2.f32 %v2072_v24 }
0x19fa   :  { %v2580_v23 = vpop.eup %2579 }
0x19fb   :  { %1320 = vrot.lane.b32.xlu0 %v2580_v23, %s2764_s22 }
0x19fc   :  { %v2582_v25 = vpop.eup %2581 }
0x19fd   :  { %v1314_v26 = vadd.f32 1.0, %v2582_v25 }
0x19ff   :  { %2583 = vrcp.f32 %v1314_v26 }
0x1a09   :  { %v2584_v27 = vpop.eup %2583 }
0x1a0a   :  { %v1318_v30 = vmul.f32 %v2584_v27, %v1227_v14 }
0x1a6d   :  { %v1321_v28 = vpop.permute.xlu0 %1320 }
0x1a6e   :  { %v1323_v29 = vmul.f32 %v2584_v27, %v1321_v28 }
0x1a70   :  { %1325 = vrot.lane.b32.xlu1 %v1323_v29, %s2755_s29 }
0x1ae2   :  { %v1326_v31 = vpop.permute.xlu1 %1325 }
0x1ae3   :  { %v1328_v32 = vadd.f32 %v1326_v31, %v1318_v30  ;;  %v1638_v31 = vld [vmem:[#allocation2 + $0xa] sm:$0x3] }
0x1ae5   :  { %2585 = vtanh.f32 %v1328_v32 }
0x1aef   :  { %v2586_v33 = vpop.eup %2585 }
0x1af0   :  { %1331 = vrot.lane.b32.xlu0 %v2586_v33, %s2764_s22 }
0x1b62   :  { %v1332_v34 = vpop.permute.xlu0 %1331 }
0x1b63   :  { %v1334_v35 = vmul.f32 %v2584_v27, %v1332_v34 }
0x1b65   :  { %1337 = vrot.lane.b32.xlu1 %v1334_v35, %s2755_s29 }
0x1bd7   :  { %v1338_v36 = vpop.permute.xlu1 %1337 }
0x1bd8   :  { %2316 = vmatmul.mubr.msk.f32.vlgmr.msra.gmra.mrb[12].mxu0 %vm197_vm3, %v1338_v36 }
0x1bd9   :  { %2466 = vmatpush3.bf16.msra.mxu0 %v3029_v48  ;;  %2337 = vmatprep.mubr.msk.f32.mxu0 %vm2762_vm0, %v2763_v1 }
0x1bda   :  { %2467 = vmatprep.subr.bf16.mxu0 %v2761_v0 }
0x1bdd   :  { %2469 = vmatpush3.bf16.msra.mxu0 %v3032_v52 }
0x1bde   :  { %2476 = vmatprep.subr.bf16.mxu0 %v2761_v0 }
0x1cab   :  { %v1407_v38 = vpop.f32.mrb[12].mxu0 }
0x1cac   :  { %v1411_v39 = vadd.f32 %v1407_v38, %v1335_v37  ;;  %v2317_v40 = vpop.f32.mrb[13].mxu0 }
0x1cae   :  { %2587 = vtanh.f32 %v1411_v39  ;;  %v2074_v42 = vmul.f32 -1.442695, %v1411_v39 }
0x1cb0   :  { %2589 = vpow2.f32 %v2074_v42 }
0x1cb8   :  { %v2588_v41 = vpop.eup %2587 }
0x1cb9   :  { %1421 = vrot.lane.b32.xlu0 %v2588_v41, %s2764_s22 }
0x1cba   :  { %v2590_v43 = vpop.eup %2589 }
0x1cbb   :  { %v1415_v44 = vadd.f32 1.0, %v2590_v43 }
0x1cbd   :  { %2591 = vrcp.f32 %v1415_v44 }
0x1cc7   :  { %v2592_v45 = vpop.eup %2591 }
0x1cc8   :  { %v1419_v49 = vmul.f32 %v2592_v45, %v1328_v32 }
0x1d2b   :  { %v1422_v46 = vpop.permute.xlu0 %1421 }
0x1d2c   :  { %v1424_v47 = vmul.f32 %v2592_v45, %v1422_v46 }
0x1d2e   :  { %1426 = vrot.lane.b32.xlu1 %v1424_v47, %s2755_s29  ;;  %v1739_v47 = vld [vmem:[#allocation2 + $0xc] sm:$0x3] }
0x1da0   :  { %v1427_v50 = vpop.permute.xlu1 %1426 }
0x1da1   :  { %v1429_v51 = vadd.f32 %v1427_v50, %v1419_v49 }
0x1da3   :  { %2593 = vtanh.f32 %v1429_v51 }
0x1dad   :  { %v2594_v53 = vpop.eup %2593 }
0x1dae   :  { %1432 = vrot.lane.b32.xlu0 %v2594_v53, %s2764_s22 }
0x1e20   :  { %v1433_v54 = vpop.permute.xlu0 %1432 }
0x1e21   :  { %v1435_v8 = vmul.f32 %v2592_v45, %v1433_v54 }
0x1e23   :  { %1438 = vrot.lane.b32.xlu1 %v1435_v8, %s2755_s29 }
0x1e95   :  { %v1439_v55 = vpop.permute.xlu1 %1438 }
0x1e96   :  { %2327 = vmatmul.mubr.msk.f32.vlgmr.msra.gmra.mrb[12].mxu1 %vm197_vm3, %v1439_v55 }
0x1e97   :  { %2472 = vmatpush3.bf16.msra.mxu1 %v3029_v48  ;;  %2348 = vmatprep.mubr.msk.f32.mxu1 %vm2762_vm0, %v2763_v1 }
0x1e98   :  { %2473 = vmatprep.subr.bf16.mxu1 %v2761_v0 }
0x1e9b   :  { %2475 = vmatpush3.bf16.msra.mxu1 %v3032_v52 }
0x1e9c   :  { %2482 = vmatprep.subr.bf16.mxu1 %v2761_v0 }
0x1f69   :  { %v1508_v57 = vpop.f32.mrb[12].mxu1 }
0x1f6a   :  { %v1512_v58 = vadd.f32 %v1508_v57, %v1436_v56  ;;  %v2328_v10 = vpop.f32.mrb[13].mxu1 }
0x1f6c   :  { %2595 = vtanh.f32 %v1512_v58  ;;  %v2076_v60 = vmul.f32 -1.442695, %v1512_v58 }
0x1f6e   :  { %2597 = vpow2.f32 %v2076_v60 }
0x1f76   :  { %v2596_v59 = vpop.eup %2595 }
0x1f77   :  { %1522 = vrot.lane.b32.xlu0 %v2596_v59, %s2764_s22 }
0x1f78   :  { %v2598_v61 = vpop.eup %2597 }
0x1f79   :  { %v1516_v62 = vadd.f32 1.0, %v2598_v61 }
0x1f7b   :  { %2599 = vrcp.f32 %v1516_v62 }
0x1f85   :  { %v2600_v63 = vpop.eup %2599 }
0x1f86   :  { %v1520_v4 = vmul.f32 %v2600_v63, %v1429_v51 }
0x1fe9   :  { %v1523_v2 = vpop.permute.xlu0 %1522 }
0x1fea   :  { %v1525_v3 = vmul.f32 %v2600_v63, %v1523_v2  ;;  %v1840_v2 = vld [vmem:[#allocation2 + $0xe] sm:$0x3] }
0x1fec   :  { %1527 = vrot.lane.b32.xlu1 %v1525_v3, %s2755_s29 }
0x205e   :  { %v1528_v5 = vpop.permute.xlu1 %1527 }
0x205f   :  { %v1530_v6 = vadd.f32 %v1528_v5, %v1520_v4 }
0x2061   :  { %2601 = vtanh.f32 %v1530_v6 }
0x206b   :  { %v2602_v7 = vpop.eup %2601 }
0x206c   :  { %1533 = vrot.lane.b32.xlu0 %v2602_v7, %s2764_s22 }
0x20de   :  { %v1534_v9 = vpop.permute.xlu0 %1533 }
0x20df   :  { %v1536_v11 = vmul.f32 %v2600_v63, %v1534_v9 }
0x20e1   :  { %1539 = vrot.lane.b32.xlu1 %v1536_v11, %s2755_s29 }
0x2153   :  { %v1540_v12 = vpop.permute.xlu1 %1539 }
0x2154   :  { %2338 = vmatmul.mubr.msk.f32.vlgmr.msra.gmra.mrb[14].mxu0 %vm197_vm3, %v1540_v12 }
0x2155   :  { %2478 = vmatpush3.bf16.msra.mxu0 %v3029_v48  ;;  %2359 = vmatprep.mubr.msk.f32.mxu0 %vm2762_vm0, %v2763_v1 }
0x2156   :  { %2479 = vmatprep.subr.bf16.mxu0 %v2761_v0 }
0x2159   :  { %2481 = vmatpush3.bf16.msra.mxu0 %v3032_v52 }
0x215a   :  { %2488 = vmatprep.subr.bf16.mxu0 %v2761_v0 }
0x2227   :  { %v1609_v14 = vpop.f32.mrb[14].mxu0 }
0x2228   :  { %v1613_v15 = vadd.f32 %v1609_v14, %v1537_v13  ;;  %v2339_v16 = vpop.f32.mrb[15].mxu0 }
0x222a   :  { %2603 = vtanh.f32 %v1613_v15  ;;  %v2078_v18 = vmul.f32 -1.442695, %v1613_v15 }
0x222c   :  { %2605 = vpow2.f32 %v2078_v18  ;;  %v1941_v18 = vld [vmem:[%s3165_s9] sm:$0xff] }
0x2234   :  { %v2604_v17 = vpop.eup %2603 }
0x2235   :  { %1623 = vrot.lane.b32.xlu0 %v2604_v17, %s2764_s22 }
0x2236   :  { %v2606_v19 = vpop.eup %2605 }
0x2237   :  { %v1617_v20 = vadd.f32 1.0, %v2606_v19  ;;  %v1942_v19 = vld [vmem:[%s3165_s9 + $0x8] sm:$0xff] }
0x2239   :  { %2607 = vrcp.f32 %v1617_v20  ;;  %v1943_v20 = vld [vmem:[%s3165_s9 + $0x10] sm:$0xff] }
0x2243   :  { %v2608_v21 = vpop.eup %2607 }
0x2244   :  { %v1621_v24 = vmul.f32 %v2608_v21, %v1530_v6 }
0x22a7   :  { %v1624_v22 = vpop.permute.xlu0 %1623 }
0x22a8   :  { %v1626_v23 = vmul.f32 %v2608_v21, %v1624_v22  ;;  %v1944_v22 = vld [vmem:[%s3165_s9 + $0x18] sm:$0xff]  ;;  %s2765_s9 = smov [#allocation12]  }
0x22a9   :  { %s2035_s20 = sshll.u32 %s2765_s9, 4  ;;  %s2036_s20 = int_to_ptr.vmem [resolvable:$true] %s2035_s20 }
0x22aa   :  { %1628 = vrot.lane.b32.xlu1 %v1626_v23, %s2755_s29  ;;  %v2492_v23 = vpack.c.bf16 %v1944_v22, %v1943_v20  ;;  %s2723_s30 = scalar_lea.vmem %s2036_s20, 32  ;;  %p2728_p5 = scmp.lt.s32.totalorder %s2036_s20, %s2036_s20 }
0x22ab   :  { %p2724_p4 = scmp.ne.s32.totalorder %s2036_s20, %s2723_s30  ;;  %p2729_p6 = scmp.lt.s32.totalorder %s2723_s30, %s2723_s30 }
0x22ad   :  { %p2730_p7 = por %p2729_p6, %p2728_p5 }
0x22af   :  { %p2731_p8 = pnand %p2730_p7, %p2724_p4 }
0x231c   :  { %v1629_v25 = vpop.permute.xlu1 %1628 }
0x231d   :  { %v1631_v26 = vadd.f32 %v1629_v25, %v1621_v24 }
0x231f   :  { %2609 = vtanh.f32 %v1631_v26 }
0x2329   :  { %v2610_v27 = vpop.eup %2609 }
0x232a   :  { %1634 = vrot.lane.b32.xlu0 %v2610_v27, %s2764_s22 }
0x239c   :  { %v1635_v28 = vpop.permute.xlu0 %1634 }
0x239d   :  { %v1637_v29 = vmul.f32 %v2608_v21, %v1635_v28  ;;  %v2489_v21 = vpack.c.bf16 %v1942_v19, %v1941_v18  ;;  %v2085_v28 = vld [vmem:[%s3166_s10] ss:$0 sm:$0xff] }
0x239f   :  { %1640 = vrot.lane.b32.xlu1 %v1637_v29, %s2755_s29 }
0x2411   :  { %v1641_v30 = vpop.permute.xlu1 %1640 }
0x2412   :  { %2349 = vmatmul.mubr.msk.f32.vlgmr.msra.gmra.mrb[14].mxu1 %vm197_vm3, %v1641_v30 }
0x2413   :  { %2484 = vmatpush3.bf16.msra.mxu1 %v3029_v48  ;;  %2370 = vmatprep.mubr.msk.f32.mxu1 %vm2762_vm0, %v2763_v1 }
0x2414   :  { %2485 = vmatprep.subr.bf16.mxu1 %v2761_v0 }
0x2417   :  { %2487 = vmatpush3.bf16.msra.mxu1 %v3032_v52 }
0x24e5   :  { %v1710_v32 = vpop.f32.mrb[14].mxu1 }
0x24e6   :  { %v1714_v33 = vadd.f32 %v1710_v32, %v1638_v31  ;;  %v2350_v34 = vpop.f32.mrb[15].mxu1 }
0x24e8   :  { %2611 = vtanh.f32 %v1714_v33  ;;  %v2080_v36 = vmul.f32 -1.442695, %v1714_v33 }
0x24ea   :  { %2613 = vpow2.f32 %v2080_v36 }
0x24f2   :  { %v2612_v35 = vpop.eup %2611 }
0x24f3   :  { %1724 = vrot.lane.b32.xlu0 %v2612_v35, %s2764_s22 }
0x24f4   :  { %v2614_v37 = vpop.eup %2613 }
0x24f5   :  { %v1718_v38 = vadd.f32 1.0, %v2614_v37 }
0x24f7   :  { %2615 = vrcp.f32 %v1718_v38 }
0x2501   :  { %v2616_v48 = vpop.eup %2615 }
0x2502   :  { %v1722_v41 = vmul.f32 %v2616_v48, %v1631_v26 }
0x2565   :  { %v1725_v39 = vpop.permute.xlu0 %1724 }
0x2566   :  { %v1727_v40 = vmul.f32 %v2616_v48, %v1725_v39 }
0x2568   :  { %1729 = vrot.lane.b32.xlu1 %v1727_v40, %s2755_s29 }
0x25da   :  { %v1730_v52 = vpop.permute.xlu1 %1729 }
0x25db   :  { %v1732_v42 = vadd.f32 %v1730_v52, %v1722_v41 }
0x25dd   :  { %2617 = vtanh.f32 %v1732_v42 }
0x25e7   :  { %v2618_v43 = vpop.eup %2617 }
0x25e8   :  { %1735 = vrot.lane.b32.xlu0 %v2618_v43, %s2764_s22 }
0x265a   :  { %v1736_v44 = vpop.permute.xlu0 %1735 }
0x265b   :  { %v1738_v45 = vmul.f32 %v2616_v48, %v1736_v44 }
0x265d   :  { %1741 = vrot.lane.b32.xlu1 %v1738_v45, %s2755_s29 }
0x26cf   :  { %v1742_v46 = vpop.permute.xlu1 %1741 }
0x26d0   :  { %2360 = vmatmul.mubr.msk.f32.vlgmr.msra.gmra.mrb[16].mxu0 %vm197_vm3, %v1742_v46 }
0x26d1   :  { %2381 = vmatprep.mubr.msk.f32.mxu0 %vm2762_vm0, %v2763_v1  ;;  %2490 = vmatpush3.bf16.msra.mxu0 %v2489_v21 }
0x26d2   :  { %2491 = vmatprep.subr.bf16.mxu0 %v2761_v0 }
0x26d5   :  { %2493 = vmatpush3.bf16.msra.mxu0 %v2492_v23 }
0x27a3   :  { %v1811_v49 = vpop.f32.mrb[16].mxu0 }
0x27a4   :  { %v1815_v50 = vadd.f32 %v1811_v49, %v1739_v47  ;;  %v2361_v51 = vpop.f32.mrb[17].mxu0 }
0x27a6   :  { %2619 = vtanh.f32 %v1815_v50  ;;  %v2082_v54 = vmul.f32 -1.442695, %v1815_v50 }
0x27a8   :  { %2621 = vpow2.f32 %v2082_v54 }
0x27b0   :  { %v2620_v53 = vpop.eup %2619 }
0x27b1   :  { %1825 = vrot.lane.b32.xlu0 %v2620_v53, %s2764_s22 }
0x27b2   :  { %v2622_v8 = vpop.eup %2621 }
0x27b3   :  { %v1819_v55 = vadd.f32 1.0, %v2622_v8 }
0x27b5   :  { %2623 = vrcp.f32 %v1819_v55 }
0x27bf   :  { %v2624_v56 = vpop.eup %2623 }
0x27c0   :  { %v1823_v10 = vmul.f32 %v2624_v56, %v1732_v42 }
0x2823   :  { %v1826_v57 = vpop.permute.xlu0 %1825 }
0x2824   :  { %v1828_v58 = vmul.f32 %v2624_v56, %v1826_v57 }
0x2826   :  { %1830 = vrot.lane.b32.xlu1 %v1828_v58, %s2755_s29 }
0x2898   :  { %v1831_v1 = vpop.permute.xlu1 %1830 }
0x2899   :  { %v1833_v59 = vadd.f32 %v1831_v1, %v1823_v10 }
0x289b   :  { %2625 = vtanh.f32 %v1833_v59 }
0x28a5   :  { %v2626_v60 = vpop.eup %2625 }
0x28a6   :  { %1836 = vrot.lane.b32.xlu0 %v2626_v60, %s2764_s22 }
0x2918   :  { %v1837_v61 = vpop.permute.xlu0 %1836 }
0x2919   :  { %v1839_v62 = vmul.f32 %v2624_v56, %v1837_v61 }
0x291b   :  { %1842 = vrot.lane.b32.xlu1 %v1839_v62, %s2755_s29 }
0x298d   :  { %v1843_v63 = vpop.permute.xlu1 %1842 }
0x298e   :  { %2371 = vmatmul.mubr.msk.f32.vlgmr.msra.gmra.mrb[16].mxu1 %vm197_vm3, %v1843_v63 }
0x2a61   :  { %v1912_v3 = vpop.f32.mrb[16].mxu1 }
0x2a62   :  { %v1916_v4 = vadd.f32 %v1912_v3, %v1840_v2  ;;  %v2372_v5 = vpop.f32.mrb[17].mxu1 }
0x2a64   :  { %2627 = vtanh.f32 %v1916_v4  ;;  %v2084_v7 = vmul.f32 -1.442695, %v1916_v4 }
0x2a66   :  { %2629 = vpow2.f32 %v2084_v7 }
0x2a6e   :  { %v2628_v6 = vpop.eup %2627 }
0x2a6f   :  { %1926 = vrot.lane.b32.xlu0 %v2628_v6, %s2764_s22 }
0x2a70   :  { %v2630_v9 = vpop.eup %2629 }
0x2a71   :  { %v1920_v11 = vadd.f32 1.0, %v2630_v9 }
0x2a73   :  { %2631 = vrcp.f32 %v1920_v11 }
0x2a7d   :  { %v2632_v12 = vpop.eup %2631 }
0x2a7e   :  { %v1924_v15 = vmul.f32 %v2632_v12, %v1833_v59 }
0x2ae1   :  { %v1927_v13 = vpop.permute.xlu0 %1926 }
0x2ae2   :  { %v1929_v14 = vmul.f32 %v2632_v12, %v1927_v13 }
0x2ae4   :  { %1931 = vrot.lane.b32.xlu1 %v1929_v14, %s2755_s29 }
0x2b56   :  { %v1932_v16 = vpop.permute.xlu1 %1931 }
0x2b57   :  { %v1934_v17 = vadd.f32 %v1932_v16, %v1924_v15 }
0x2b59   :  { %2633 = vtanh.f32 %v1934_v17 }
0x2b63   :  { %v2634_v24 = vpop.eup %2633 }
0x2b64   :  { %1937 = vrot.lane.b32.xlu0 %v2634_v24, %s2764_s22 }
0x2bd6   :  { %v1938_v25 = vpop.permute.xlu0 %1937 }
0x2bd7   :  { %v1940_v26 = vmul.f32 %v2632_v12, %v1938_v25 }
0x2bd9   :  { %1953 = vrot.lane.b32.xlu1 %v1940_v26, %s2755_s29 }
0x2c4b   :  { %v1954_v27 = vpop.permute.xlu1 %1953 }
0x2c4c   :  { %2382 = vmatmul.mubr.msk.f32.vlgmr.msra.gmra.mrb[18].mxu0 %vm197_vm3, %v1954_v27 }
0x2d1f   :  { %v2023_v29 = vpop.f32.mrb[18].mxu0 }
0x2d20   :  { %v2024_v0 = vadd.f32 %v2085_v28, %v2023_v29  ;;  %v2383_v30 = vpop.f32.mrb[19].mxu0 }
0x2d22   :  { %2028 = vst.msk [vmem:[#allocation12] sm:$0x3] %vm2027_vm5, %v2024_v0 }
0x2d23   :  { %2734 = shalt.err (!%p2731_p8)
}
0x2d24   :  { %s2735_s21 = scalar_lea.hbm %s3167_s11, 32 }
0x2d25   :  { %p2736_p9 = scmp.ne.s32.totalorder %s3167_s11, %s2735_s21  ;;  %p2739_p10 = scmp.lt.u32.totalorder %s2735_s21, %s3167_s11 }
0x2d27   :  { %p2741_p11 = pnand %p2739_p10, %p2736_p9 }
0x2d29   :  { %2744 = shalt.err (!%p2741_p11)
}
0x2d2a   :  { %2038 = dma.vmem_to_hbm [thread:$0]  %s2036_s20, 32, %s3167_s11, [#allocation6]  }
0x2d2b   :  { %2751 = dma.done.wait [#allocation6], 32  }
0x2d2c   :  { %2752 = vsyncadd [#allocation6], 4294967264 }
0x2d2d   :  { %2042 = vsyncpa [#allocation5], 1 }
0x2d2e   :  { %2043 = vsyncpa [#allocation8], 1 }
0x2d2f   :  { %2044 = vsyncpa [#allocation11], 1 }
0x2d30   :  { %2045 = vsyncpa [#allocation6], 1 }

</bundles_post_ra>
